<compile_context>
chip_gen: v6e
topology: v6e:2x2x1
jax: 0.10.0
libtpu: 0.0.40
codegen_flags: <defaults>
</compile_context>

<pallas_src>
import math

import jax
import jax.numpy as jnp
from jax.experimental import pallas as pl
from jax.experimental.pallas import tpu as pltpu

# ----------------------- model hyper-parameters (small) ----------------------
D_MODEL = 32          # conv input channels
D_MODEL_OUT = 32      # embed dim
NHEAD = 4
HEAD_DIM = D_MODEL_OUT // NHEAD
DIM_FF = 64
LN_EPS = 1e-5


def _layernorm(v, g, b):
    mu = jnp.mean(v, axis=-1, keepdims=True)
    var = jnp.mean((v - mu) ** 2, axis=-1, keepdims=True)
    return (v - mu) * jax.lax.rsqrt(var + LN_EPS) * g + b


def _gelu_exact(x):  # reference only (PyTorch GELU default = erf form)
    return 0.5 * x * (1.0 + jax.lax.erf(x * 0.7071067811865476))


# ------------------------------- Pallas kernel -------------------------------
def sfa_kernel(x_ref, wp_ref, wqkv_ref, wo_ref, w1_ref, w2_ref, vec_ref,
               out_ref):
    Bt, C_in, N = x_ref.shape
    C = wp_ref.shape[1]
    F = w1_ref.shape[1]
    M = Bt * N
    H, Hd = NHEAD, C // NHEAD
    bf16 = jnp.bfloat16

    # packed small vectors (one DMA):
    # rows = [bp, g13, b13, bo, g12, b12, b2, bqkv(3C), b1(F)], lane-padded.
    vec = vec_ref[...]
    bp, g13, b13 = vec[0, :C], vec[1, :C], vec[2, :C]
    bo, g12, b12, b2 = vec[3, :C], vec[4, :C], vec[5, :C], vec[6, :C]
    bqkv = vec[7, :3 * C]
    b1 = vec[8, :F]

    def mm(a_f32, w_bf16):
        # bf16 operands on the MXU, f32 accumulation
        return jnp.dot(a_f32.astype(bf16), w_bf16,
                       preferred_element_type=jnp.float32)

    # ---- input_proj (Conv1d k=1): fold every batch element's positions into
    # ---- a single (Bt*N, C_in) slab (cheap 2-D XLU transposes, MXU sees
    # ---- the tallest possible M).
    x = x_ref[...]                                                # (Bt, C_in, N)
    x_nc = jnp.concatenate([x[b].T for b in range(Bt)], axis=0)   # (M, C_in)

    y = mm(x_nc, wp_ref[...]) + bp                                # (M, C)

    # ---- norm13 (src1 == src2 -> a single LayerNorm)
    xn = _layernorm(y, g13, b13)

    # ---- fused QKV projection: one (M, C) x (C, 3C) matmul
    qkv = mm(xn, wqkv_ref[...]) + bqkv                            # (M, 3C)
    scale = 1.0 / math.sqrt(Hd)
    q = (qkv[:, 0 * C:1 * C] * scale).reshape(Bt, N, C)           # scale folded
    k = qkv[:, 1 * C:2 * C].reshape(Bt, N, C)
    v = qkv[:, 2 * C:3 * C].reshape(Bt, N, C)

    # ---- multi-head scaled-dot-product self-attention, batched over Bt
    head_outs = []
    for h in range(H):                                            # static unroll
        sl = slice(h * Hd, (h + 1) * Hd)
        qh = q[..., sl].astype(bf16)                              # (Bt, N, Hd)
        kh = k[..., sl].astype(bf16)
        vh = v[..., sl].astype(bf16)
        s = jnp.einsum("bqd,bkd->bqk", qh, kh,
                       preferred_element_type=jnp.float32)
        s = s - jnp.max(s, axis=-1, keepdims=True)
        p = jnp.exp(s)
        p = p * pl.reciprocal(jnp.sum(p, axis=-1, keepdims=True), approx=True)
        head_outs.append(jnp.einsum("bqk,bkd->bqd", p.astype(bf16), vh,
                                    preferred_element_type=jnp.float32))
    attn = jnp.concatenate(head_outs, axis=-1).reshape(M, C)      # (M, C)

    o = mm(attn, wo_ref[...]) + bo

    # ---- residual + norm12
    s1 = _layernorm(xn + o, g12, b12)

    # ---- feed-forward: linear12(GELU(linear11(s1)))
    h1 = mm(s1, w1_ref[...]) + b1
    # TODO(synk): PyTorch default GELU is the erf form; tanh approximation is
    # used here (EUP-friendly, within validation tolerance).
    h1 = jax.nn.gelu(h1, approximate=True)
    h2 = mm(h1, w2_ref[...]) + b2

    # ---- residual, emit in PyTorch NCW layout directly
    y_out = (s1 + h2).reshape(Bt, N, C)
    for b in range(Bt):                                           # static unroll
        out_ref[b] = y_out[b].T                                   # (C, N)


# --------------------------------- wrapper -----------------------------------
def _choose_batch_tile(B, N, max_rows=512):
    """Largest divisor of B with Bt*N <= max_rows (whole batch if it fits)."""
    bt = max(1, min(B, max(1, max_rows // max(N, 1))))
    while B % bt:
        bt -= 1
    return bt


def sfa_block(x_ncw, params, batch_tile=None):
    """x_ncw: (B, C_in, N) like the PyTorch module. Returns (B, C_out, N)."""
    B, C_in, N = x_ncw.shape
    C = params["wp"].shape[1]
    F = params["w1"].shape[1]
    Bt = batch_tile if batch_tile is not None else _choose_batch_tile(B, N)
    assert B % Bt == 0, "batch tile must divide B (pad B otherwise)"

    bf16 = jnp.bfloat16
    # Fused / packed parameters (fewer, better-shaped DMAs; bf16 MXU weights).
    wp = params["wp"].astype(bf16)
    wqkv = jnp.concatenate([params["wq"], params["wk"], params["wv"]],
                           axis=1).astype(bf16)                   # (C, 3C)
    wo = params["wo"].astype(bf16)
    w1 = params["w1"].astype(bf16)
    w2 = params["w2"].astype(bf16)

    W = max(3 * C, F)

    def pad(row):
        return jnp.pad(row, ((0, 0), (0, W - row.shape[1])))

    vec = jnp.concatenate(
        [pad(params["bp"]), pad(params["g13"]), pad(params["b13"]),
         pad(params["bo"]), pad(params["g12"]), pad(params["b12"]),
         pad(params["b2"]),
         pad(jnp.concatenate([params["bq"], params["bk"], params["bv"]],
                             axis=1)),
         pad(params["b1"])],
        axis=0).astype(jnp.float32)                               # (9, W)

    plist = [wp, wqkv, wo, w1, w2, vec]

    in_specs = ([pl.BlockSpec((Bt, C_in, N), lambda i: (i, 0, 0))]
                + [pl.BlockSpec(a.shape, lambda i: (0, 0)) for a in plist])

    out = pl.pallas_call(
        sfa_kernel,
        out_shape=jax.ShapeDtypeStruct((B, C, N), jnp.float32),
        grid=(B // Bt,),
        in_specs=in_specs,
        out_specs=pl.BlockSpec((Bt, C, N), lambda i: (i, 0, 0)),
        compiler_params=pltpu.CompilerParams(
            dimension_semantics=("parallel",)),
    )(x_ncw, *plist)

    return out                                                    # (B, C_out, N)


# ---------------------------- pure-JAX reference ------------------------------
def sfa_reference(x_ncw, p):
    x = jnp.transpose(x_ncw, (0, 2, 1))                           # (B, N, C_in)
    y = jnp.einsum("bnc,cd->bnd", x, p["wp"]) + p["bp"]
    xn = _layernorm(y, p["g13"], p["b13"])
    q = jnp.einsum("bnc,cd->bnd", xn, p["wq"]) + p["bq"]
    k = jnp.einsum("bnc,cd->bnd", xn, p["wk"]) + p["bk"]
    v = jnp.einsum("bnc,cd->bnd", xn, p["wv"]) + p["bv"]
    B, N, C = q.shape
    qh = q.reshape(B, N, NHEAD, HEAD_DIM)
    kh = k.reshape(B, N, NHEAD, HEAD_DIM)
    vh = v.reshape(B, N, NHEAD, HEAD_DIM)
    s = jnp.einsum("bqhd,bkhd->bhqk", qh, kh) / math.sqrt(HEAD_DIM)
    pattn = jax.nn.softmax(s, axis=-1)
    o = jnp.einsum("bhqk,bkhd->bqhd", pattn, vh).reshape(B, N, C)
    attn = jnp.einsum("bnc,cd->bnd", o, p["wo"]) + p["bo"]
    s1 = _layernorm(xn + attn, p["g12"], p["b12"])
    h1 = _gelu_exact(jnp.einsum("bnc,cf->bnf", s1, p["w1"]) + p["b1"])
    h2 = jnp.einsum("bnf,fc->bnc", h1, p["w2"]) + p["b2"]
    return jnp.transpose(s1 + h2, (0, 2, 1))


# ----------------------------------- main -------------------------------------
if __name__ == "__main__":
    key = jax.random.PRNGKey(0)
    keys = jax.random.split(key, 20)

    def rnd(k, shape, scale=0.05):
        return (scale * jax.random.normal(k, shape)).astype(jnp.float32)

    C, F = D_MODEL_OUT, DIM_FF
    params = {
        # input_proj (Conv1d k=1): weight stored transposed (C_in, C_out)
        "wp": rnd(keys[0], (D_MODEL, C)), "bp": rnd(keys[1], (1, C)),
        # norm13
        "g13": jnp.ones((1, C), jnp.float32) + rnd(keys[2], (1, C), 0.01),
        "b13": rnd(keys[3], (1, C), 0.01),
        # MHA in_proj (split & transposed) and out_proj
        "wq": rnd(keys[4], (C, C)), "bq": rnd(keys[5], (1, C)),
        "wk": rnd(keys[6], (C, C)), "bk": rnd(keys[7], (1, C)),
        "wv": rnd(keys[8], (C, C)), "bv": rnd(keys[9], (1, C)),
        "wo": rnd(keys[10], (C, C)), "bo": rnd(keys[11], (1, C)),
        # norm12
        "g12": jnp.ones((1, C), jnp.float32) + rnd(keys[12], (1, C), 0.01),
        "b12": rnd(keys[13], (1, C), 0.01),
        # feed-forward
        "w1": rnd(keys[14], (C, F)), "b1": rnd(keys[15], (1, F)),
        "w2": rnd(keys[16], (F, C)), "b2": rnd(keys[17], (1, C)),
    }

    B, N = 4, 16
    x = jax.random.normal(keys[18], (B, D_MODEL, N), dtype=jnp.float32)

    out = sfa_block(x, params)           # Bt=4 -> single grid step, M=64 slab
    out = jax.block_until_ready(out)

    ref = sfa_reference(x, params)
    assert out.shape == (B, D_MODEL_OUT, N)
    assert bool(jnp.all(jnp.isfinite(out)))
    # kernel uses bf16 matmul operands + tanh GELU + approx reciprocal,
    # reference is exact f32 -> compare at a loose-but-meaningful tolerance
    assert bool(jnp.allclose(out, ref, rtol=2e-2, atol=2e-2))

    print("KERNEL_OK")
</pallas_src>

<mosaic_0001>
module attributes {stable_mosaic.version = 11 : i64} {
  func.func @sfa_kernel(%arg0: i32, %arg1: memref<4x32x16xf32, #tpu.memory_space<vmem>>, %arg2: memref<32x32xbf16, #tpu.memory_space<vmem>>, %arg3: memref<32x96xbf16, #tpu.memory_space<vmem>>, %arg4: memref<32x32xbf16, #tpu.memory_space<vmem>>, %arg5: memref<32x64xbf16, #tpu.memory_space<vmem>>, %arg6: memref<64x32xbf16, #tpu.memory_space<vmem>>, %arg7: memref<9x96xf32, #tpu.memory_space<vmem>>, %arg8: memref<4x32x16xf32, #tpu.memory_space<vmem>>) attributes {dimension_semantics = [#tpu.dimension_semantics<parallel>], iteration_bounds = array<i64: 1>, scalar_prefetch = 0 : i64, scratch_operands = 0 : i64, tpu.core_type = #tpu.core_type<tc>, window_params = [{transform_indices = @transform_0, window_bounds = array<i64: 4, 32, 16>}, {pipeline_mode = #tpu.pipeline_mode<synchronous>, transform_indices = @transform_1, window_bounds = array<i64: 32, 32>}, {pipeline_mode = #tpu.pipeline_mode<synchronous>, transform_indices = @transform_2, window_bounds = array<i64: 32, 96>}, {pipeline_mode = #tpu.pipeline_mode<synchronous>, transform_indices = @transform_3, window_bounds = array<i64: 32, 32>}, {pipeline_mode = #tpu.pipeline_mode<synchronous>, transform_indices = @transform_4, window_bounds = array<i64: 32, 64>}, {pipeline_mode = #tpu.pipeline_mode<synchronous>, transform_indices = @transform_5, window_bounds = array<i64: 64, 32>}, {pipeline_mode = #tpu.pipeline_mode<synchronous>, transform_indices = @transform_6, window_bounds = array<i64: 9, 96>}, {transform_indices = @transform_7, window_bounds = array<i64: 4, 32, 16>}]} {
    %c0 = arith.constant 0 : index
    %c0_0 = arith.constant 0 : index
    %0 = vector.load %arg7[%c0, %c0_0] : memref<9x96xf32, #tpu.memory_space<vmem>>, vector<9x96xf32>
    %1 = vector.extract_strided_slice %0 {offsets = [0, 0], sizes = [1, 32], strides = [1, 1]} : vector<9x96xf32> to vector<1x32xf32>
    %2 = vector.shape_cast %1 : vector<1x32xf32> to vector<32xf32>
    %3 = vector.extract_strided_slice %0 {offsets = [1, 0], sizes = [1, 32], strides = [1, 1]} : vector<9x96xf32> to vector<1x32xf32>
    %4 = vector.shape_cast %3 : vector<1x32xf32> to vector<32xf32>
    %5 = vector.extract_strided_slice %0 {offsets = [2, 0], sizes = [1, 32], strides = [1, 1]} : vector<9x96xf32> to vector<1x32xf32>
    %6 = vector.shape_cast %5 : vector<1x32xf32> to vector<32xf32>
    %7 = vector.extract_strided_slice %0 {offsets = [3, 0], sizes = [1, 32], strides = [1, 1]} : vector<9x96xf32> to vector<1x32xf32>
    %8 = vector.shape_cast %7 : vector<1x32xf32> to vector<32xf32>
    %9 = vector.extract_strided_slice %0 {offsets = [4, 0], sizes = [1, 32], strides = [1, 1]} : vector<9x96xf32> to vector<1x32xf32>
    %10 = vector.shape_cast %9 : vector<1x32xf32> to vector<32xf32>
    %11 = vector.extract_strided_slice %0 {offsets = [5, 0], sizes = [1, 32], strides = [1, 1]} : vector<9x96xf32> to vector<1x32xf32>
    %12 = vector.shape_cast %11 : vector<1x32xf32> to vector<32xf32>
    %13 = vector.extract_strided_slice %0 {offsets = [6, 0], sizes = [1, 32], strides = [1, 1]} : vector<9x96xf32> to vector<1x32xf32>
    %14 = vector.shape_cast %13 : vector<1x32xf32> to vector<32xf32>
    %15 = vector.extract_strided_slice %0 {offsets = [7, 0], sizes = [1, 96], strides = [1, 1]} : vector<9x96xf32> to vector<1x96xf32>
    %16 = vector.shape_cast %15 : vector<1x96xf32> to vector<96xf32>
    %17 = vector.extract_strided_slice %0 {offsets = [8, 0], sizes = [1, 64], strides = [1, 1]} : vector<9x96xf32> to vector<1x64xf32>
    %18 = vector.shape_cast %17 : vector<1x64xf32> to vector<64xf32>
    %c0_1 = arith.constant 0 : index
    %c0_2 = arith.constant 0 : index
    %c0_3 = arith.constant 0 : index
    %19 = vector.load %arg1[%c0_1, %c0_2, %c0_3] : memref<4x32x16xf32, #tpu.memory_space<vmem>>, vector<4x32x16xf32>
    %20 = vector.extract_strided_slice %19 {offsets = [0, 0, 0], sizes = [1, 32, 16], strides = [1, 1, 1]} : vector<4x32x16xf32> to vector<1x32x16xf32>
    %21 = vector.shape_cast %20 : vector<1x32x16xf32> to vector<32x16xf32>
    %22 = tpu.transpose %21, [1, 0] : vector<32x16xf32> -> vector<16x32xf32>
    %23 = vector.extract_strided_slice %19 {offsets = [1, 0, 0], sizes = [1, 32, 16], strides = [1, 1, 1]} : vector<4x32x16xf32> to vector<1x32x16xf32>
    %24 = vector.shape_cast %23 : vector<1x32x16xf32> to vector<32x16xf32>
    %25 = tpu.transpose %24, [1, 0] : vector<32x16xf32> -> vector<16x32xf32>
    %26 = vector.extract_strided_slice %19 {offsets = [2, 0, 0], sizes = [1, 32, 16], strides = [1, 1, 1]} : vector<4x32x16xf32> to vector<1x32x16xf32>
    %27 = vector.shape_cast %26 : vector<1x32x16xf32> to vector<32x16xf32>
    %28 = tpu.transpose %27, [1, 0] : vector<32x16xf32> -> vector<16x32xf32>
    %29 = vector.extract_strided_slice %19 {offsets = [3, 0, 0], sizes = [1, 32, 16], strides = [1, 1, 1]} : vector<4x32x16xf32> to vector<1x32x16xf32>
    %30 = vector.shape_cast %29 : vector<1x32x16xf32> to vector<32x16xf32>
    %31 = tpu.transpose %30, [1, 0] : vector<32x16xf32> -> vector<16x32xf32>
    %32 = tpu.concatenate %22, %25, %28, %31 in 0 : vector<16x32xf32>, vector<16x32xf32>, vector<16x32xf32>, vector<16x32xf32> -> vector<64x32xf32>
    %c0_4 = arith.constant 0 : index
    %c0_5 = arith.constant 0 : index
    %33 = vector.load %arg2[%c0_4, %c0_5] : memref<32x32xbf16, #tpu.memory_space<vmem>>, vector<32x32xbf16>
    %34 = arith.truncf %32 : vector<64x32xf32> to vector<64x32xbf16>
    %cst = arith.constant dense<0.000000e+00> : vector<64x32xf32>
    %35 = tpu.matmul %34, %33, %cst {dimension_numbers = #tpu.dot_dimension_numbers<[1], [0], [0], [1], [0, 0, 1, 1], [], []>} : vector<64x32xbf16>, vector<32x32xbf16>, vector<64x32xf32> -> vector<64x32xf32>
    %36 = vector.shape_cast %2 : vector<32xf32> to vector<1x32xf32>
    %37 = vector.broadcast %36 : vector<1x32xf32> to vector<64x32xf32>
    %38 = arith.addf %35, %37 : vector<64x32xf32>
    %cst_6 = arith.constant dense<0.000000e+00> : vector<64xf32>
    %39 = vector.multi_reduction <add>, %38, %cst_6 [1] : vector<64x32xf32> to vector<64xf32>
    %40 = vector.shape_cast %39 : vector<64xf32> to vector<64x1xf32>
    %cst_7 = arith.constant 3.200000e+01 : f32
    %41 = vector.broadcast %cst_7 : f32 to vector<64x1xf32>
    %42 = arith.divf %40, %41 : vector<64x1xf32>
    %43 = vector.broadcast %42 : vector<64x1xf32> to vector<64x32xf32>
    %44 = arith.subf %38, %43 : vector<64x32xf32>
    %45 = arith.mulf %44, %44 : vector<64x32xf32>
    %cst_8 = arith.constant dense<0.000000e+00> : vector<64xf32>
    %46 = vector.multi_reduction <add>, %45, %cst_8 [1] : vector<64x32xf32> to vector<64xf32>
    %47 = vector.shape_cast %46 : vector<64xf32> to vector<64x1xf32>
    %cst_9 = arith.constant 3.200000e+01 : f32
    %48 = vector.broadcast %cst_9 : f32 to vector<64x1xf32>
    %49 = arith.divf %47, %48 : vector<64x1xf32>
    %50 = vector.broadcast %42 : vector<64x1xf32> to vector<64x32xf32>
    %51 = arith.subf %38, %50 : vector<64x32xf32>
    %cst_10 = arith.constant 9.99999974E-6 : f32
    %52 = vector.broadcast %cst_10 : f32 to vector<64x1xf32>
    %53 = arith.addf %49, %52 : vector<64x1xf32>
    %54 = math.rsqrt %53 : vector<64x1xf32>
    %55 = vector.broadcast %54 : vector<64x1xf32> to vector<64x32xf32>
    %56 = arith.mulf %51, %55 : vector<64x32xf32>
    %57 = vector.shape_cast %4 : vector<32xf32> to vector<1x32xf32>
    %58 = vector.broadcast %57 : vector<1x32xf32> to vector<64x32xf32>
    %59 = arith.mulf %56, %58 : vector<64x32xf32>
    %60 = vector.shape_cast %6 : vector<32xf32> to vector<1x32xf32>
    %61 = vector.broadcast %60 : vector<1x32xf32> to vector<64x32xf32>
    %62 = arith.addf %59, %61 : vector<64x32xf32>
    %c0_11 = arith.constant 0 : index
    %c0_12 = arith.constant 0 : index
    %63 = vector.load %arg3[%c0_11, %c0_12] : memref<32x96xbf16, #tpu.memory_space<vmem>>, vector<32x96xbf16>
    %64 = arith.truncf %62 : vector<64x32xf32> to vector<64x32xbf16>
    %cst_13 = arith.constant dense<0.000000e+00> : vector<64x96xf32>
    %65 = tpu.matmul %64, %63, %cst_13 {dimension_numbers = #tpu.dot_dimension_numbers<[1], [0], [0], [1], [0, 0, 1, 1], [], []>} : vector<64x32xbf16>, vector<32x96xbf16>, vector<64x96xf32> -> vector<64x96xf32>
    %66 = vector.shape_cast %16 : vector<96xf32> to vector<1x96xf32>
    %67 = vector.broadcast %66 : vector<1x96xf32> to vector<64x96xf32>
    %68 = arith.addf %65, %67 : vector<64x96xf32>
    %69 = vector.extract_strided_slice %68 {offsets = [0, 0], sizes = [64, 32], strides = [1, 1]} : vector<64x96xf32> to vector<64x32xf32>
    %cst_14 = arith.constant 0.353553385 : f32
    %70 = vector.broadcast %cst_14 : f32 to vector<64x32xf32>
    %71 = arith.mulf %69, %70 : vector<64x32xf32>
    %72 = vector.shape_cast %71 : vector<64x32xf32> to vector<4x16x32xf32>
    %73 = vector.extract_strided_slice %68 {offsets = [0, 32], sizes = [64, 32], strides = [1, 1]} : vector<64x96xf32> to vector<64x32xf32>
    %74 = vector.shape_cast %73 : vector<64x32xf32> to vector<4x16x32xf32>
    %75 = vector.extract_strided_slice %68 {offsets = [0, 64], sizes = [64, 32], strides = [1, 1]} : vector<64x96xf32> to vector<64x32xf32>
    %76 = vector.shape_cast %75 : vector<64x32xf32> to vector<4x16x32xf32>
    %77 = vector.extract_strided_slice %72 {offsets = [0, 0, 0], sizes = [4, 16, 8], strides = [1, 1, 1]} : vector<4x16x32xf32> to vector<4x16x8xf32>
    %78 = arith.truncf %77 : vector<4x16x8xf32> to vector<4x16x8xbf16>
    %79 = vector.extract_strided_slice %74 {offsets = [0, 0, 0], sizes = [4, 16, 8], strides = [1, 1, 1]} : vector<4x16x32xf32> to vector<4x16x8xf32>
    %80 = arith.truncf %79 : vector<4x16x8xf32> to vector<4x16x8xbf16>
    %81 = vector.extract_strided_slice %76 {offsets = [0, 0, 0], sizes = [4, 16, 8], strides = [1, 1, 1]} : vector<4x16x32xf32> to vector<4x16x8xf32>
    %82 = arith.truncf %81 : vector<4x16x8xf32> to vector<4x16x8xbf16>
    "tpu.trace_start"() <{level = 10 : i32, message = "bqd,bkd->bqk"}> : () -> ()
    %cst_15 = arith.constant dense<0.000000e+00> : vector<4x16x16xf32>
    %83 = tpu.matmul %78, %80, %cst_15 {dimension_numbers = #tpu.dot_dimension_numbers<[2], [2], [1], [1], [0, 0, 0, 1, 1, 1], [0], [0]>} : vector<4x16x8xbf16>, vector<4x16x8xbf16>, vector<4x16x16xf32> -> vector<4x16x16xf32>
    "tpu.trace_stop"() : () -> ()
    %cst_16 = arith.constant dense<0xFF800000> : vector<4x16xf32>
    %84 = vector.multi_reduction <maximumf>, %83, %cst_16 [2] : vector<4x16x16xf32> to vector<4x16xf32>
    %85 = vector.shape_cast %84 : vector<4x16xf32> to vector<4x16x1xf32>
    %86 = vector.broadcast %85 : vector<4x16x1xf32> to vector<4x16x16xf32>
    %87 = arith.subf %83, %86 : vector<4x16x16xf32>
    %88 = math.exp %87 : vector<4x16x16xf32>
    %cst_17 = arith.constant dense<0.000000e+00> : vector<4x16xf32>
    %89 = vector.multi_reduction <add>, %88, %cst_17 [2] : vector<4x16x16xf32> to vector<4x16xf32>
    %90 = vector.shape_cast %89 : vector<4x16xf32> to vector<4x16x1xf32>
    %91 = tpu.reciprocal %90 {approx = true} : vector<4x16x1xf32> -> vector<4x16x1xf32>
    %92 = vector.broadcast %91 : vector<4x16x1xf32> to vector<4x16x16xf32>
    %93 = arith.mulf %88, %92 : vector<4x16x16xf32>
    %94 = arith.truncf %93 : vector<4x16x16xf32> to vector<4x16x16xbf16>
    "tpu.trace_start"() <{level = 10 : i32, message = "bqk,bkd->bqd"}> : () -> ()
    %cst_18 = arith.constant dense<0.000000e+00> : vector<4x16x8xf32>
    %95 = tpu.matmul %94, %82, %cst_18 {dimension_numbers = #tpu.dot_dimension_numbers<[2], [1], [1], [2], [0, 0, 0, 1, 1, 2], [0], [0]>} : vector<4x16x16xbf16>, vector<4x16x8xbf16>, vector<4x16x8xf32> -> vector<4x16x8xf32>
    "tpu.trace_stop"() : () -> ()
    %96 = vector.extract_strided_slice %72 {offsets = [0, 0, 8], sizes = [4, 16, 8], strides = [1, 1, 1]} : vector<4x16x32xf32> to vector<4x16x8xf32>
    %97 = arith.truncf %96 : vector<4x16x8xf32> to vector<4x16x8xbf16>
    %98 = vector.extract_strided_slice %74 {offsets = [0, 0, 8], sizes = [4, 16, 8], strides = [1, 1, 1]} : vector<4x16x32xf32> to vector<4x16x8xf32>
    %99 = arith.truncf %98 : vector<4x16x8xf32> to vector<4x16x8xbf16>
    %100 = vector.extract_strided_slice %76 {offsets = [0, 0, 8], sizes = [4, 16, 8], strides = [1, 1, 1]} : vector<4x16x32xf32> to vector<4x16x8xf32>
    %101 = arith.truncf %100 : vector<4x16x8xf32> to vector<4x16x8xbf16>
    "tpu.trace_start"() <{level = 10 : i32, message = "bqd,bkd->bqk"}> : () -> ()
    %cst_19 = arith.constant dense<0.000000e+00> : vector<4x16x16xf32>
    %102 = tpu.matmul %97, %99, %cst_19 {dimension_numbers = #tpu.dot_dimension_numbers<[2], [2], [1], [1], [0, 0, 0, 1, 1, 1], [0], [0]>} : vector<4x16x8xbf16>, vector<4x16x8xbf16>, vector<4x16x16xf32> -> vector<4x16x16xf32>
    "tpu.trace_stop"() : () -> ()
    %cst_20 = arith.constant dense<0xFF800000> : vector<4x16xf32>
    %103 = vector.multi_reduction <maximumf>, %102, %cst_20 [2] : vector<4x16x16xf32> to vector<4x16xf32>
    %104 = vector.shape_cast %103 : vector<4x16xf32> to vector<4x16x1xf32>
    %105 = vector.broadcast %104 : vector<4x16x1xf32> to vector<4x16x16xf32>
    %106 = arith.subf %102, %105 : vector<4x16x16xf32>
    %107 = math.exp %106 : vector<4x16x16xf32>
    %cst_21 = arith.constant dense<0.000000e+00> : vector<4x16xf32>
    %108 = vector.multi_reduction <add>, %107, %cst_21 [2] : vector<4x16x16xf32> to vector<4x16xf32>
    %109 = vector.shape_cast %108 : vector<4x16xf32> to vector<4x16x1xf32>
    %110 = tpu.reciprocal %109 {approx = true} : vector<4x16x1xf32> -> vector<4x16x1xf32>
    %111 = vector.broadcast %110 : vector<4x16x1xf32> to vector<4x16x16xf32>
    %112 = arith.mulf %107, %111 : vector<4x16x16xf32>
    %113 = arith.truncf %112 : vector<4x16x16xf32> to vector<4x16x16xbf16>
    "tpu.trace_start"() <{level = 10 : i32, message = "bqk,bkd->bqd"}> : () -> ()
    %cst_22 = arith.constant dense<0.000000e+00> : vector<4x16x8xf32>
    %114 = tpu.matmul %113, %101, %cst_22 {dimension_numbers = #tpu.dot_dimension_numbers<[2], [1], [1], [2], [0, 0, 0, 1, 1, 2], [0], [0]>} : vector<4x16x16xbf16>, vector<4x16x8xbf16>, vector<4x16x8xf32> -> vector<4x16x8xf32>
    "tpu.trace_stop"() : () -> ()
    %115 = vector.extract_strided_slice %72 {offsets = [0, 0, 16], sizes = [4, 16, 8], strides = [1, 1, 1]} : vector<4x16x32xf32> to vector<4x16x8xf32>
    %116 = arith.truncf %115 : vector<4x16x8xf32> to vector<4x16x8xbf16>
    %117 = vector.extract_strided_slice %74 {offsets = [0, 0, 16], sizes = [4, 16, 8], strides = [1, 1, 1]} : vector<4x16x32xf32> to vector<4x16x8xf32>
    %118 = arith.truncf %117 : vector<4x16x8xf32> to vector<4x16x8xbf16>
    %119 = vector.extract_strided_slice %76 {offsets = [0, 0, 16], sizes = [4, 16, 8], strides = [1, 1, 1]} : vector<4x16x32xf32> to vector<4x16x8xf32>
    %120 = arith.truncf %119 : vector<4x16x8xf32> to vector<4x16x8xbf16>
    "tpu.trace_start"() <{level = 10 : i32, message = "bqd,bkd->bqk"}> : () -> ()
    %cst_23 = arith.constant dense<0.000000e+00> : vector<4x16x16xf32>
    %121 = tpu.matmul %116, %118, %cst_23 {dimension_numbers = #tpu.dot_dimension_numbers<[2], [2], [1], [1], [0, 0, 0, 1, 1, 1], [0], [0]>} : vector<4x16x8xbf16>, vector<4x16x8xbf16>, vector<4x16x16xf32> -> vector<4x16x16xf32>
    "tpu.trace_stop"() : () -> ()
    %cst_24 = arith.constant dense<0xFF800000> : vector<4x16xf32>
    %122 = vector.multi_reduction <maximumf>, %121, %cst_24 [2] : vector<4x16x16xf32> to vector<4x16xf32>
    %123 = vector.shape_cast %122 : vector<4x16xf32> to vector<4x16x1xf32>
    %124 = vector.broadcast %123 : vector<4x16x1xf32> to vector<4x16x16xf32>
    %125 = arith.subf %121, %124 : vector<4x16x16xf32>
    %126 = math.exp %125 : vector<4x16x16xf32>
    %cst_25 = arith.constant dense<0.000000e+00> : vector<4x16xf32>
    %127 = vector.multi_reduction <add>, %126, %cst_25 [2] : vector<4x16x16xf32> to vector<4x16xf32>
    %128 = vector.shape_cast %127 : vector<4x16xf32> to vector<4x16x1xf32>
    %129 = tpu.reciprocal %128 {approx = true} : vector<4x16x1xf32> -> vector<4x16x1xf32>
    %130 = vector.broadcast %129 : vector<4x16x1xf32> to vector<4x16x16xf32>
    %131 = arith.mulf %126, %130 : vector<4x16x16xf32>
    %132 = arith.truncf %131 : vector<4x16x16xf32> to vector<4x16x16xbf16>
    "tpu.trace_start"() <{level = 10 : i32, message = "bqk,bkd->bqd"}> : () -> ()
    %cst_26 = arith.constant dense<0.000000e+00> : vector<4x16x8xf32>
    %133 = tpu.matmul %132, %120, %cst_26 {dimension_numbers = #tpu.dot_dimension_numbers<[2], [1], [1], [2], [0, 0, 0, 1, 1, 2], [0], [0]>} : vector<4x16x16xbf16>, vector<4x16x8xbf16>, vector<4x16x8xf32> -> vector<4x16x8xf32>
    "tpu.trace_stop"() : () -> ()
    %134 = vector.extract_strided_slice %72 {offsets = [0, 0, 24], sizes = [4, 16, 8], strides = [1, 1, 1]} : vector<4x16x32xf32> to vector<4x16x8xf32>
    %135 = arith.truncf %134 : vector<4x16x8xf32> to vector<4x16x8xbf16>
    %136 = vector.extract_strided_slice %74 {offsets = [0, 0, 24], sizes = [4, 16, 8], strides = [1, 1, 1]} : vector<4x16x32xf32> to vector<4x16x8xf32>
    %137 = arith.truncf %136 : vector<4x16x8xf32> to vector<4x16x8xbf16>
    %138 = vector.extract_strided_slice %76 {offsets = [0, 0, 24], sizes = [4, 16, 8], strides = [1, 1, 1]} : vector<4x16x32xf32> to vector<4x16x8xf32>
    %139 = arith.truncf %138 : vector<4x16x8xf32> to vector<4x16x8xbf16>
    "tpu.trace_start"() <{level = 10 : i32, message = "bqd,bkd->bqk"}> : () -> ()
    %cst_27 = arith.constant dense<0.000000e+00> : vector<4x16x16xf32>
    %140 = tpu.matmul %135, %137, %cst_27 {dimension_numbers = #tpu.dot_dimension_numbers<[2], [2], [1], [1], [0, 0, 0, 1, 1, 1], [0], [0]>} : vector<4x16x8xbf16>, vector<4x16x8xbf16>, vector<4x16x16xf32> -> vector<4x16x16xf32>
    "tpu.trace_stop"() : () -> ()
    %cst_28 = arith.constant dense<0xFF800000> : vector<4x16xf32>
    %141 = vector.multi_reduction <maximumf>, %140, %cst_28 [2] : vector<4x16x16xf32> to vector<4x16xf32>
    %142 = vector.shape_cast %141 : vector<4x16xf32> to vector<4x16x1xf32>
    %143 = vector.broadcast %142 : vector<4x16x1xf32> to vector<4x16x16xf32>
    %144 = arith.subf %140, %143 : vector<4x16x16xf32>
    %145 = math.exp %144 : vector<4x16x16xf32>
    %cst_29 = arith.constant dense<0.000000e+00> : vector<4x16xf32>
    %146 = vector.multi_reduction <add>, %145, %cst_29 [2] : vector<4x16x16xf32> to vector<4x16xf32>
    %147 = vector.shape_cast %146 : vector<4x16xf32> to vector<4x16x1xf32>
    %148 = tpu.reciprocal %147 {approx = true} : vector<4x16x1xf32> -> vector<4x16x1xf32>
    %149 = vector.broadcast %148 : vector<4x16x1xf32> to vector<4x16x16xf32>
    %150 = arith.mulf %145, %149 : vector<4x16x16xf32>
    %151 = arith.truncf %150 : vector<4x16x16xf32> to vector<4x16x16xbf16>
    "tpu.trace_start"() <{level = 10 : i32, message = "bqk,bkd->bqd"}> : () -> ()
    %cst_30 = arith.constant dense<0.000000e+00> : vector<4x16x8xf32>
    %152 = tpu.matmul %151, %139, %cst_30 {dimension_numbers = #tpu.dot_dimension_numbers<[2], [1], [1], [2], [0, 0, 0, 1, 1, 2], [0], [0]>} : vector<4x16x16xbf16>, vector<4x16x8xbf16>, vector<4x16x8xf32> -> vector<4x16x8xf32>
    "tpu.trace_stop"() : () -> ()
    %153 = tpu.concatenate %95, %114, %133, %152 in 2 : vector<4x16x8xf32>, vector<4x16x8xf32>, vector<4x16x8xf32>, vector<4x16x8xf32> -> vector<4x16x32xf32>
    %154 = vector.shape_cast %153 : vector<4x16x32xf32> to vector<64x32xf32>
    %c0_31 = arith.constant 0 : index
    %c0_32 = arith.constant 0 : index
    %155 = vector.load %arg4[%c0_31, %c0_32] : memref<32x32xbf16, #tpu.memory_space<vmem>>, vector<32x32xbf16>
    %156 = arith.truncf %154 : vector<64x32xf32> to vector<64x32xbf16>
    %cst_33 = arith.constant dense<0.000000e+00> : vector<64x32xf32>
    %157 = tpu.matmul %156, %155, %cst_33 {dimension_numbers = #tpu.dot_dimension_numbers<[1], [0], [0], [1], [0, 0, 1, 1], [], []>} : vector<64x32xbf16>, vector<32x32xbf16>, vector<64x32xf32> -> vector<64x32xf32>
    %158 = vector.shape_cast %8 : vector<32xf32> to vector<1x32xf32>
    %159 = vector.broadcast %158 : vector<1x32xf32> to vector<64x32xf32>
    %160 = arith.addf %157, %159 : vector<64x32xf32>
    %161 = arith.addf %62, %160 : vector<64x32xf32>
    %cst_34 = arith.constant dense<0.000000e+00> : vector<64xf32>
    %162 = vector.multi_reduction <add>, %161, %cst_34 [1] : vector<64x32xf32> to vector<64xf32>
    %163 = vector.shape_cast %162 : vector<64xf32> to vector<64x1xf32>
    %cst_35 = arith.constant 3.200000e+01 : f32
    %164 = vector.broadcast %cst_35 : f32 to vector<64x1xf32>
    %165 = arith.divf %163, %164 : vector<64x1xf32>
    %166 = vector.broadcast %165 : vector<64x1xf32> to vector<64x32xf32>
    %167 = arith.subf %161, %166 : vector<64x32xf32>
    %168 = arith.mulf %167, %167 : vector<64x32xf32>
    %cst_36 = arith.constant dense<0.000000e+00> : vector<64xf32>
    %169 = vector.multi_reduction <add>, %168, %cst_36 [1] : vector<64x32xf32> to vector<64xf32>
    %170 = vector.shape_cast %169 : vector<64xf32> to vector<64x1xf32>
    %cst_37 = arith.constant 3.200000e+01 : f32
    %171 = vector.broadcast %cst_37 : f32 to vector<64x1xf32>
    %172 = arith.divf %170, %171 : vector<64x1xf32>
    %173 = vector.broadcast %165 : vector<64x1xf32> to vector<64x32xf32>
    %174 = arith.subf %161, %173 : vector<64x32xf32>
    %cst_38 = arith.constant 9.99999974E-6 : f32
    %175 = vector.broadcast %cst_38 : f32 to vector<64x1xf32>
    %176 = arith.addf %172, %175 : vector<64x1xf32>
    %177 = math.rsqrt %176 : vector<64x1xf32>
    %178 = vector.broadcast %177 : vector<64x1xf32> to vector<64x32xf32>
    %179 = arith.mulf %174, %178 : vector<64x32xf32>
    %180 = vector.shape_cast %10 : vector<32xf32> to vector<1x32xf32>
    %181 = vector.broadcast %180 : vector<1x32xf32> to vector<64x32xf32>
    %182 = arith.mulf %179, %181 : vector<64x32xf32>
    %183 = vector.shape_cast %12 : vector<32xf32> to vector<1x32xf32>
    %184 = vector.broadcast %183 : vector<1x32xf32> to vector<64x32xf32>
    %185 = arith.addf %182, %184 : vector<64x32xf32>
    %c0_39 = arith.constant 0 : index
    %c0_40 = arith.constant 0 : index
    %186 = vector.load %arg5[%c0_39, %c0_40] : memref<32x64xbf16, #tpu.memory_space<vmem>>, vector<32x64xbf16>
    %187 = arith.truncf %185 : vector<64x32xf32> to vector<64x32xbf16>
    %cst_41 = arith.constant dense<0.000000e+00> : vector<64x64xf32>
    %188 = tpu.matmul %187, %186, %cst_41 {dimension_numbers = #tpu.dot_dimension_numbers<[1], [0], [0], [1], [0, 0, 1, 1], [], []>} : vector<64x32xbf16>, vector<32x64xbf16>, vector<64x64xf32> -> vector<64x64xf32>
    %189 = vector.shape_cast %18 : vector<64xf32> to vector<1x64xf32>
    %190 = vector.broadcast %189 : vector<1x64xf32> to vector<64x64xf32>
    %191 = arith.addf %188, %190 : vector<64x64xf32>
    %192 = arith.mulf %191, %191 : vector<64x64xf32>
    %193 = arith.mulf %191, %192 : vector<64x64xf32>
    %cst_42 = arith.constant 4.471500e-02 : f32
    %194 = vector.broadcast %cst_42 : f32 to vector<64x64xf32>
    %195 = arith.mulf %194, %193 : vector<64x64xf32>
    %196 = arith.addf %191, %195 : vector<64x64xf32>
    %cst_43 = arith.constant 0.797884583 : f32
    %197 = vector.broadcast %cst_43 : f32 to vector<64x64xf32>
    %198 = arith.mulf %197, %196 : vector<64x64xf32>
    %199 = math.tanh %198 : vector<64x64xf32>
    %cst_44 = arith.constant 1.000000e+00 : f32
    %200 = vector.broadcast %cst_44 : f32 to vector<64x64xf32>
    %201 = arith.addf %200, %199 : vector<64x64xf32>
    %cst_45 = arith.constant 5.000000e-01 : f32
    %202 = vector.broadcast %cst_45 : f32 to vector<64x64xf32>
    %203 = arith.mulf %202, %201 : vector<64x64xf32>
    %204 = arith.mulf %191, %203 : vector<64x64xf32>
    %c0_46 = arith.constant 0 : index
    %c0_47 = arith.constant 0 : index
    %205 = vector.load %arg6[%c0_46, %c0_47] : memref<64x32xbf16, #tpu.memory_space<vmem>>, vector<64x32xbf16>
    %206 = arith.truncf %204 : vector<64x64xf32> to vector<64x64xbf16>
    %cst_48 = arith.constant dense<0.000000e+00> : vector<64x32xf32>
    %207 = tpu.matmul %206, %205, %cst_48 {dimension_numbers = #tpu.dot_dimension_numbers<[1], [0], [0], [1], [0, 0, 1, 1], [], []>} : vector<64x64xbf16>, vector<64x32xbf16>, vector<64x32xf32> -> vector<64x32xf32>
    %208 = vector.shape_cast %14 : vector<32xf32> to vector<1x32xf32>
    %209 = vector.broadcast %208 : vector<1x32xf32> to vector<64x32xf32>
    %210 = arith.addf %207, %209 : vector<64x32xf32>
    %211 = arith.addf %185, %210 : vector<64x32xf32>
    %212 = vector.shape_cast %211 : vector<64x32xf32> to vector<4x16x32xf32>
    %213 = vector.extract_strided_slice %212 {offsets = [0, 0, 0], sizes = [1, 16, 32], strides = [1, 1, 1]} : vector<4x16x32xf32> to vector<1x16x32xf32>
    %214 = vector.shape_cast %213 : vector<1x16x32xf32> to vector<16x32xf32>
    %215 = tpu.transpose %214, [1, 0] : vector<16x32xf32> -> vector<32x16xf32>
    %c0_49 = arith.constant 0 : index
    %c0_50 = arith.constant 0 : index
    %c0_51 = arith.constant 0 : index
    %216 = vector.load %arg8[%c0_49, %c0_50, %c0_51] : memref<4x32x16xf32, #tpu.memory_space<vmem>>, vector<1x32x16xf32>
    %217 = vector.shape_cast %216 : vector<1x32x16xf32> to vector<32x16xf32>
    %218 = vector.shape_cast %215 : vector<32x16xf32> to vector<1x32x16xf32>
    tpu.vector_store %arg8[%c0_49, %c0_50, %c0_51], %218 {strides = array<i32>} : memref<4x32x16xf32, #tpu.memory_space<vmem>>, vector<1x32x16xf32>,
    %219 = vector.extract_strided_slice %212 {offsets = [1, 0, 0], sizes = [1, 16, 32], strides = [1, 1, 1]} : vector<4x16x32xf32> to vector<1x16x32xf32>
    %220 = vector.shape_cast %219 : vector<1x16x32xf32> to vector<16x32xf32>
    %221 = tpu.transpose %220, [1, 0] : vector<16x32xf32> -> vector<32x16xf32>
    %c1 = arith.constant 1 : index
    %c0_52 = arith.constant 0 : index
    %c0_53 = arith.constant 0 : index
    %222 = vector.load %arg8[%c1, %c0_52, %c0_53] : memref<4x32x16xf32, #tpu.memory_space<vmem>>, vector<1x32x16xf32>
    %223 = vector.shape_cast %222 : vector<1x32x16xf32> to vector<32x16xf32>
    %224 = vector.shape_cast %221 : vector<32x16xf32> to vector<1x32x16xf32>
    tpu.vector_store %arg8[%c1, %c0_52, %c0_53], %224 {strides = array<i32>} : memref<4x32x16xf32, #tpu.memory_space<vmem>>, vector<1x32x16xf32>,
    %225 = vector.extract_strided_slice %212 {offsets = [2, 0, 0], sizes = [1, 16, 32], strides = [1, 1, 1]} : vector<4x16x32xf32> to vector<1x16x32xf32>
    %226 = vector.shape_cast %225 : vector<1x16x32xf32> to vector<16x32xf32>
    %227 = tpu.transpose %226, [1, 0] : vector<16x32xf32> -> vector<32x16xf32>
    %c2 = arith.constant 2 : index
    %c0_54 = arith.constant 0 : index
    %c0_55 = arith.constant 0 : index
    %228 = vector.load %arg8[%c2, %c0_54, %c0_55] : memref<4x32x16xf32, #tpu.memory_space<vmem>>, vector<1x32x16xf32>
    %229 = vector.shape_cast %228 : vector<1x32x16xf32> to vector<32x16xf32>
    %230 = vector.shape_cast %227 : vector<32x16xf32> to vector<1x32x16xf32>
    tpu.vector_store %arg8[%c2, %c0_54, %c0_55], %230 {strides = array<i32>} : memref<4x32x16xf32, #tpu.memory_space<vmem>>, vector<1x32x16xf32>,
    %231 = vector.extract_strided_slice %212 {offsets = [3, 0, 0], sizes = [1, 16, 32], strides = [1, 1, 1]} : vector<4x16x32xf32> to vector<1x16x32xf32>
    %232 = vector.shape_cast %231 : vector<1x16x32xf32> to vector<16x32xf32>
    %233 = tpu.transpose %232, [1, 0] : vector<16x32xf32> -> vector<32x16xf32>
    %c3 = arith.constant 3 : index
    %c0_56 = arith.constant 0 : index
    %c0_57 = arith.constant 0 : index
    %234 = vector.load %arg8[%c3, %c0_56, %c0_57] : memref<4x32x16xf32, #tpu.memory_space<vmem>>, vector<1x32x16xf32>
    %235 = vector.shape_cast %234 : vector<1x32x16xf32> to vector<32x16xf32>
    %236 = vector.shape_cast %233 : vector<32x16xf32> to vector<1x32x16xf32>
    tpu.vector_store %arg8[%c3, %c0_56, %c0_57], %236 {strides = array<i32>} : memref<4x32x16xf32, #tpu.memory_space<vmem>>, vector<1x32x16xf32>,
    return
  }
  func.func @transform_0(%arg0: i32) -> (i32, i32, i32) {
    %c0_i32 = arith.constant 0 : i32
    %c0_i32_0 = arith.constant 0 : i32
    %c0_i32_1 = arith.constant 0 : i32
    return %arg0, %c0_i32, %c0_i32_0 : i32, i32, i32
  }
  func.func @transform_1(%arg0: i32) -> (i32, i32) {
    %c0_i32 = arith.constant 0 : i32
    %c0_i32_0 = arith.constant 0 : i32
    %c0_i32_1 = arith.constant 0 : i32
    return %c0_i32, %c0_i32_0 : i32, i32
  }
  func.func @transform_2(%arg0: i32) -> (i32, i32) {
    %c0_i32 = arith.constant 0 : i32
    %c0_i32_0 = arith.constant 0 : i32
    %c0_i32_1 = arith.constant 0 : i32
    return %c0_i32, %c0_i32_0 : i32, i32
  }
  func.func @transform_3(%arg0: i32) -> (i32, i32) {
    %c0_i32 = arith.constant 0 : i32
    %c0_i32_0 = arith.constant 0 : i32
    %c0_i32_1 = arith.constant 0 : i32
    return %c0_i32, %c0_i32_0 : i32, i32
  }
  func.func @transform_4(%arg0: i32) -> (i32, i32) {
    %c0_i32 = arith.constant 0 : i32
    %c0_i32_0 = arith.constant 0 : i32
    %c0_i32_1 = arith.constant 0 : i32
    return %c0_i32, %c0_i32_0 : i32, i32
  }
  func.func @transform_5(%arg0: i32) -> (i32, i32) {
    %c0_i32 = arith.constant 0 : i32
    %c0_i32_0 = arith.constant 0 : i32
    %c0_i32_1 = arith.constant 0 : i32
    return %c0_i32, %c0_i32_0 : i32, i32
  }
  func.func @transform_6(%arg0: i32) -> (i32, i32) {
    %c0_i32 = arith.constant 0 : i32
    %c0_i32_0 = arith.constant 0 : i32
    %c0_i32_1 = arith.constant 0 : i32
    return %c0_i32, %c0_i32_0 : i32, i32
  }
  func.func @transform_7(%arg0: i32) -> (i32, i32, i32) {
    %c0_i32 = arith.constant 0 : i32
    %c0_i32_0 = arith.constant 0 : i32
    %c0_i32_1 = arith.constant 0 : i32
    return %arg0, %c0_i32, %c0_i32_0 : i32, i32, i32
  }
}

</mosaic_0001>

<bundles_post_ra>
// kernel: tpu_custom_call.1
= control target key start
LH: loop header
LB: loop body
LE: loop exit
PB: predicated region body
PF: predicated region fallthrough
CT: control target
= control target key end

     0   :  { %vm197_vm0 = vcmask 261120   ;;  %v181_v42 = vlaneseq  ;;  %vm4002_vm1 = vmmov 0   ;;  %vm524_vm2 = vcmask 64512   ;;  %s4004_s18 = smov 64   ;;  %s4005_s19 = smov 88   ;;  %s4917_s0 = inlined_call_operand.vmem [shape: f32[4,32,16], index: 0, kind: input, shape index: {}]   ;;  %s4918_s1 = inlined_call_operand.vmem [shape: bf16[32,32], index: 1, kind: input, shape index: {}]   ;;  %s4919_s6 = inlined_call_operand.vmem [shape: f32[9,96], index: 6, kind: input, shape index: {}]   ;;  %s4920_s2 = inlined_call_operand.vmem [shape: bf16[32,96], index: 2, kind: input, shape index: {}]   ;;  %s4921_s3 = inlined_call_operand.vmem [shape: bf16[32,32], index: 3, kind: input, shape index: {}]   ;;  %s4922_s4 = inlined_call_operand.vmem [shape: bf16[32,64], index: 4, kind: input, shape index: {}]   ;;  %s4923_s5 = inlined_call_operand.vmem [shape: bf16[64,32], index: 5, kind: input, shape index: {}]   ;;  %s4924_s7 = inlined_call_operand.vmem [shape: f32[4,32,16], index: 7, kind: output, shape index: {}]  }
   0x1   :  { %v37_v0 = vld [vmem:[%s4917_s0 + $0x40] sm:$0xff]  ;;  %v38_v5 = vld [vmem:[%s4917_s0 + $0x48] sm:$0xff]  ;;  %v39_v12 = vld [vmem:[%s4917_s0 + $0x50] sm:$0xff]  ;;  %vm722_vm3 = vcmask 130048   ;;  %s4006_s20 = smov 120   ;;  %s4007_s21 = smov 56  }
   0x2   :  { %v41_v1 = vld [vmem:[%s4917_s0 + $0x60] sm:$0xff]  ;;  %v42_v6 = vld [vmem:[%s4917_s0 + $0x68] sm:$0xff]  ;;  %v43_v13 = vld [vmem:[%s4917_s0 + $0x70] sm:$0xff]  ;;  %v4115_v43 = vshrl.u32 %v181_v42, 7  ;;  %s4008_s22 = smov 80   ;;  %s4009_s23 = smov 112  }
   0x3   :  { %v29_v2 = vld [vmem:[%s4917_s0] sm:$0xff]  ;;  %v3734_v3 = vpack.i.bf16 %v41_v1, %v37_v0  ;;  %v30_v8 = vld [vmem:[%s4917_s0 + $0x8] sm:$0xff]  ;;  %v3736_v10 = vpack.i.bf16 %v42_v6, %v38_v5  ;;  %v31_v14 = vld [vmem:[%s4917_s0 + $0x10] sm:$0xff]  ;;  %v3738_v17 = vpack.i.bf16 %v43_v13, %v39_v12  ;;  %s4010_s24 = smov 48   ;;  %s4011_s25 = smov 72   ;;  %vm2571_vm4 = vcmask 195584  }
   0x4   :  { %v33_v4 = vld [vmem:[%s4917_s0 + $0x20] sm:$0xff]  ;;  %v34_v9 = vld [vmem:[%s4917_s0 + $0x28] sm:$0xff]  ;;  %v35_v15 = vld [vmem:[%s4917_s0 + $0x30] sm:$0xff]  ;;  %v183_v44 = vsub.s32 0, %v4115_v43  ;;  %s4012_s26 = smov 104   ;;  %s4013_s27 = smov 40  }
   0x5   :  { %v3716_v7 = vpack.i.bf16 %v33_v4, %v29_v2  ;;  %3735 = vxpose.xlu1.b32.start [1/4] (short) (narrow) %v3734_v3, 16  ;;  %v3718_v11 = vpack.i.bf16 %v34_v9, %v30_v8  ;;  %v3812_v16 = vld [vmem:[%s4918_s1 + $0x8] sm:$0xff]   ;;  %v3813_v18 = vld [vmem:[%s4918_s1] sm:$0xff]   ;;  %v3720_v19 = vpack.i.bf16 %v35_v15, %v31_v14  ;;  %v40_v20 = vld [vmem:[%s4917_s0 + $0x58] sm:$0xff]  ;;  %s4014_s28 = smov 8   ;;  %s4015_s29 = smov 16  }
   0x6   :  { %v44_v21 = vld [vmem:[%s4917_s0 + $0x78] sm:$0xff]  ;;  %3440 = vmatprep.subr.bf16.mxu0 %v3812_v16  ;;  %3696 = vmatprep.subr.bf16.mxu1 %v3812_v16  ;;  %v4121_v45 = vld [vmem:[%s4919_s6] sm:$0xff]  ;;  %s4016_s11 = smov 24   ;;  %vm3030_vm5 = vcmask 523264  }
   0x7   :  { %3717 = vxpose.xlu0.b32.start [1/4] (short) (narrow) %v3716_v7, 16  ;;  %v32_v22 = vld [vmem:[%s4917_s0 + $0x18] sm:$0xff]  ;;  %3441 = vmatpush3.bf16.msra.mxu0 %v3812_v16  ;;  %v3740_v24 = vpack.i.bf16 %v44_v21, %v40_v20  ;;  %v184_v46 = vrot.slane %v4121_v45, %v183_v44 }
   0x8   :  { %v36_v23 = vld [vmem:[%s4917_s0 + $0x38] sm:$0xff]  ;;  %3698 = vmatpush3.bf16.msra.mxu1 %v3812_v16  ;;  %3442 = vmatprep.subr.bf16.mxu0 %v3813_v18 }
   0x9   :  { %3737 = vxpose.xlu1.b32.cont [2/4] (short) (narrow) %v3736_v10, 16  ;;  %3697 = vmatprep.subr.bf16.mxu1 %v3813_v18  ;;  %v3722_v25 = vpack.i.bf16 %v36_v23, %v32_v22 }
   0xb   :  { %3719 = vxpose.xlu0.b32.cont [2/4] (short) (narrow) %v3718_v11, 16  ;;  %3443 = vmatpush3.bf16.msra.mxu0 %v3813_v18 }
   0xc   :  { %3699 = vmatpush3.bf16.msra.mxu1 %v3813_v18 }
   0xd   :  { %3739 = vxpose.xlu1.b32.cont [3/4] (short) (narrow) %v3738_v17, 16 }
   0xf   :  { %3721 = vxpose.xlu0.b32.cont [3/4] (short) (narrow) %v3720_v19, 16 }
  0x11   :  { %3741 = vxpose.xlu1.b32.end [4/4] (short) (narrow) %v3740_v24, 16 }
  0x13   :  { %3723 = vxpose.xlu0.b32.end [4/4] (short) (narrow) %v3722_v25, 16 }
  0x81   :  { %v3742_v26 = vpop.trf.xlu1 }
  0x82   :  { %v3746_v28 = vunpack.i.h.bf16 %v3742_v26  ;;  %v3743_v29 = vunpack.i.l.bf16 %v3742_v26 }
  0x83   :  { %v3724_v27 = vpop.trf.xlu0 }
  0x84   :  { %v3728_v30 = vunpack.i.h.bf16 %v3724_v27  ;;  %v3725_v32 = vunpack.i.l.bf16 %v3724_v27 }
  0x85   :  { %v3747_v31 = vpop.trf.xlu1 }
  0x86   :  { %v3751_v33 = vunpack.i.h.bf16 %v3747_v31  ;;  %v3748_v35 = vunpack.i.l.bf16 %v3747_v31 }
  0x87   :  { %v3729_v34 = vpop.trf.xlu0 }
  0x88   :  { %v3733_v36 = vunpack.i.h.bf16 %v3729_v34  ;;  %v3730_v37 = vunpack.i.l.bf16 %v3729_v34  ;;  %v179_v38 = vpack.c.bf16 %v3748_v35, %v3743_v29  ;;  %v180_v39 = vpack.c.bf16 %v3751_v33, %v3746_v28 }
  0x8a   :  { %v177_v40 = vpack.c.bf16 %v3730_v37, %v3725_v32  ;;  %v178_v41 = vpack.c.bf16 %v3733_v36, %v3728_v30  ;;  %3448 = vmatprep.mubr.msk.bf16.mxu1 %vm197_vm0, %v179_v38 }
  0x8b   :  { %3449 = vmatmul.mubr.msk.bf16.vlgmr.msra.gmra.mxu1 %vm197_vm0, %v180_v39 }
  0x8c   :  { %3444 = vmatprep.mubr.msk.bf16.mxu0 %vm197_vm0, %v177_v40 }
  0x8d   :  { %3445 = vmatmul.mubr.msk.bf16.vlgmr.msra.gmra.mxu0 %vm197_vm0, %v178_v41 }
 0x14b   :  { %v3450_v47 = vpop.f32.mrf.mxu1 }
 0x14c   :  { %v269_v60 = vadd.f32 %v3450_v47, %v184_v46 }
 0x14d   :  { %v3446_v48 = vpop.f32.mrf.mxu0  ;;  %v260_v51 = vpop.f32.mrf.mxu1 }
 0x14e   :  { %v253_v49 = vadd.f32 %v3446_v48, %v184_v46  ;;  %v261_v55 = vadd.f32 %v260_v51, %v184_v46  ;;  %v293_v3 = vsel %vm197_vm0, %v269_v60, 0.0 }
 0x14f   :  { %v244_v50 = vpop.f32.mrf.mxu0  ;;  %v3451_v57 = vpop.f32.mrf.mxu1 }
 0x150   :  { %v245_v52 = vadd.f32 %v244_v50, %v184_v46  ;;  %v281_v53 = vsel %vm197_vm0, %v253_v49, 0.0  ;;  %v287_v63 = vsel %vm197_vm0, %v261_v55, 0.0  ;;  %v272_v4 = vadd.f32 %v3451_v57, %v184_v46  ;;  %v3815_v50 = vld [vmem:[%s4920_s2] sm:$0xff]  }
 0x151   :  { %282 = vadd.xlane.f32.xlu1 %v281_v53  ;;  %v3447_v54 = vpop.f32.mrf.mxu0  ;;  %v263_v0 = vpop.f32.mrf.mxu1 }
 0x152   :  { %v275_v56 = vsel %vm197_vm0, %v245_v52, 0.0  ;;  %v256_v61 = vadd.f32 %v3447_v54, %v184_v46  ;;  %v264_v1 = vadd.f32 %v263_v0, %v184_v46  ;;  %v296_v6 = vsel %vm197_vm0, %v272_v4, 0.0 }
 0x153   :  { %v247_v58 = vpop.f32.mrf.mxu0  ;;  %276 = vadd.xlane.f32.xlu0 %v275_v56 }
 0x154   :  { %v248_v59 = vadd.f32 %v247_v58, %v184_v46  ;;  %v284_v2 = vsel %vm197_vm0, %v256_v61, 0.0  ;;  %v290_v5 = vsel %vm197_vm0, %v264_v1, 0.0 }
 0x156   :  { %v278_v62 = vsel %vm197_vm0, %v248_v59, 0.0 }
 0x157   :  { %279 = vadd.xlane.f32.xlu1 %v278_v62  ;;  %288 = vadd.xlane.f32.xlu0 %v287_v63 }
 0x15b   :  { %285 = vadd.xlane.f32.xlu1 %v284_v2  ;;  %294 = vadd.xlane.f32.xlu0 %v293_v3 }
 0x15f   :  { %291 = vadd.xlane.f32.xlu1 %v290_v5 }
 0x163   :  { %297 = vadd.xlane.f32.xlu1 %v296_v6 }
 0x1da   :  { %v283_v7 = vpop.xlane.xlu1 %282 }
 0x1db   :  { %v302_v8 = vmul.f32 0.03125, %v283_v7 }
 0x1dc   :  { %v277_v9 = vpop.xlane.xlu0 %276 }
 0x1dd   :  { %v300_v10 = vmul.f32 0.03125, %v277_v9  ;;  %v4132_v11 = vsub.f32 %v253_v49, %v302_v8  ;;  %v3814_v49 = vld [vmem:[%s4920_s2 + $0x8] sm:$0xff]   ;;  %v382_v8 = vsub.s32 1, %v4115_v43  ;;  %s4003_s2 = smov 96  }
 0x1de   :  { %3452 = vmatprep.subr.bf16.mxu1 %v3814_v49 }
 0x1df   :  { %v4134_v12 = vsub.f32 %v245_v52, %v300_v10  ;;  %v318_v18 = vmul.f32 %v4132_v11, %v4132_v11  ;;  %3453 = vmatpush3.bf16.msra.mxu1 %v3814_v49 }
 0x1e0   :  { %v280_v13 = vpop.xlane.xlu1 %279  ;;  %v289_v14 = vpop.xlane.xlu0 %288  ;;  %3454 = vmatprep.subr.bf16.mxu1 %v3815_v50 }
 0x1e1   :  { %v301_v15 = vmul.f32 0.03125, %v280_v13  ;;  %v304_v16 = vmul.f32 0.03125, %v289_v14  ;;  %v316_v17 = vmul.f32 %v4134_v12, %v4134_v12  ;;  %v330_v27 = vsel %vm197_vm0, %v318_v18, 0.0 }
 0x1e3   :  { %v4140_v19 = vsub.f32 %v248_v59, %v301_v15  ;;  %v4142_v20 = vsub.f32 %v261_v55, %v304_v16  ;;  %v324_v21 = vsel %vm197_vm0, %v316_v17, 0.0  ;;  %3455 = vmatpush3.bf16.msra.mxu1 %v3815_v50  ;;  %v383_v16 = vrot.slane %v4121_v45, %v382_v8 }
 0x1e4   :  { %v286_v22 = vpop.xlane.xlu1 %285  ;;  %325 = vadd.xlane.f32.xlu0 %v324_v21  ;;  %v295_v23 = vpop.xlane.xlu0 %294  ;;  %v394_v17 = vsub.s32 2, %v4115_v43 }
 0x1e5   :  { %v303_v24 = vmul.f32 0.03125, %v286_v22  ;;  %v306_v25 = vmul.f32 0.03125, %v295_v23  ;;  %v317_v26 = vmul.f32 %v4140_v19, %v4140_v19  ;;  %v320_v31 = vmul.f32 %v4142_v20, %v4142_v20 }
 0x1e7   :  { %v4148_v28 = vsub.f32 %v256_v61, %v303_v24  ;;  %v4150_v29 = vsub.f32 %v269_v60, %v306_v25  ;;  %v327_v30 = vsel %vm197_vm0, %v317_v26, 0.0  ;;  %v336_v37 = vsel %vm197_vm0, %v320_v31, 0.0 }
 0x1e8   :  { %328 = vadd.xlane.f32.xlu1 %v327_v30  ;;  %v292_v32 = vpop.xlane.xlu1 %291  ;;  %331 = vadd.xlane.f32.xlu0 %v330_v27  ;;  %v395_v24 = vrot.slane %v4121_v45, %v394_v17 }
 0x1e9   :  { %v305_v33 = vmul.f32 0.03125, %v292_v32  ;;  %v319_v34 = vmul.f32 %v4148_v28, %v4148_v28  ;;  %v322_v38 = vmul.f32 %v4150_v29, %v4150_v29 }
 0x1eb   :  { %v4157_v35 = vsub.f32 %v264_v1, %v305_v33  ;;  %v333_v36 = vsel %vm197_vm0, %v319_v34, 0.0  ;;  %v342_v46 = vsel %vm197_vm0, %v322_v38, 0.0 }
 0x1ec   :  { %334 = vadd.xlane.f32.xlu1 %v333_v36  ;;  %v298_v39 = vpop.xlane.xlu1 %297  ;;  %337 = vadd.xlane.f32.xlu0 %v336_v37 }
 0x1ed   :  { %v307_v40 = vmul.f32 0.03125, %v298_v39  ;;  %v321_v41 = vmul.f32 %v4157_v35, %v4157_v35 }
 0x1ef   :  { %v4165_v42 = vsub.f32 %v272_v4, %v307_v40  ;;  %v339_v44 = vsel %vm197_vm0, %v321_v41, 0.0 }
 0x1f0   :  { %340 = vadd.xlane.f32.xlu1 %v339_v44  ;;  %343 = vadd.xlane.f32.xlu0 %v342_v46 }
 0x1f1   :  { %v323_v47 = vmul.f32 %v4165_v42, %v4165_v42 }
 0x1f3   :  { %v345_v48 = vsel %vm197_vm0, %v323_v47, 0.0 }
 0x1f4   :  { %346 = vadd.xlane.f32.xlu1 %v345_v48 }
 0x26d   :  { %v326_v51 = vpop.xlane.xlu0 %325 }
 0x26e   :  { %v348_v52 = vmul.f32 0.03125, %v326_v51 }
 0x270   :  { %v356_v53 = vadd.f32 1e-05, %v348_v52 }
 0x271   :  { %v329_v54 = vpop.xlane.xlu1 %328  ;;  %v332_v55 = vpop.xlane.xlu0 %331 }
 0x272   :  { %3824 = vrsqrt.f32 %v356_v53  ;;  %v349_v56 = vmul.f32 0.03125, %v329_v54  ;;  %v350_v57 = vmul.f32 0.03125, %v332_v55  ;;  %v414_v54 = vsub.s32 7, %v4115_v43 }
 0x273   :  { %v4001_v55 = vmov 0.0  }
 0x274   :  { %v357_v58 = vadd.f32 1e-05, %v349_v56  ;;  %v358_v59 = vadd.f32 1e-05, %v350_v57  ;;  %3470 = vmatprep.subr.bf16.mxu1 %v4001_v55  ;;  %3464 = vmatprep.subr.bf16.mxu0 %v4001_v55 }
 0x275   :  { %v335_v60 = vpop.xlane.xlu1 %334  ;;  %v338_v61 = vpop.xlane.xlu0 %337  ;;  %3466 = vmatprep.mubr.msk.bf16.mxu0 %vm4002_vm1, %v4001_v55 }
 0x276   :  { %3826 = vrsqrt.f32 %v357_v58  ;;  %v351_v62 = vmul.f32 0.03125, %v335_v60  ;;  %v352_v63 = vmul.f32 0.03125, %v338_v61 }
 0x277   :  { %3828 = vrsqrt.f32 %v358_v59 }
 0x278   :  { %v359_v0 = vadd.f32 1e-05, %v351_v62  ;;  %v360_v1 = vadd.f32 1e-05, %v352_v63 }
 0x279   :  { %v341_v2 = vpop.xlane.xlu1 %340  ;;  %v344_v3 = vpop.xlane.xlu0 %343 }
 0x27a   :  { %3830 = vrsqrt.f32 %v359_v0  ;;  %v353_v4 = vmul.f32 0.03125, %v341_v2  ;;  %v354_v5 = vmul.f32 0.03125, %v344_v3 }
 0x27b   :  { %3832 = vrsqrt.f32 %v360_v1 }
 0x27c   :  { %v361_v6 = vadd.f32 1e-05, %v353_v4  ;;  %v362_v7 = vadd.f32 1e-05, %v354_v5 }
 0x27d   :  { %v347_v9 = vpop.xlane.xlu1 %346 }
 0x27e   :  { %3834 = vrsqrt.f32 %v361_v6  ;;  %v355_v10 = vmul.f32 0.03125, %v347_v9 }
 0x27f   :  { %v3825_v13 = vpop.eup %3824  ;;  %3836 = vrsqrt.f32 %v362_v7 }
 0x280   :  { %v363_v14 = vadd.f32 1e-05, %v355_v10  ;;  %v372_v15 = vmul.f32 %v3825_v13, %v4134_v12 }
 0x282   :  { %3838 = vrsqrt.f32 %v363_v14  ;;  %v384_v23 = vmul.f32 %v383_v16, %v372_v15 }
 0x283   :  { %v3827_v18 = vpop.eup %3826 }
 0x284   :  { %v3829_v21 = vpop.eup %3828  ;;  %v373_v22 = vmul.f32 %v3827_v18, %v4140_v19  ;;  %v4186_v12 = vadd.f32 %v395_v24, %v384_v23 }
 0x285   :  { %v374_v25 = vmul.f32 %v3829_v21, %v4132_v11 }
 0x286   :  { %v385_v26 = vmul.f32 %v383_v16, %v373_v22 }
 0x287   :  { %v3831_v27 = vpop.eup %3830  ;;  %v386_v33 = vmul.f32 %v383_v16, %v374_v25 }
 0x288   :  { %v3833_v30 = vpop.eup %3832  ;;  %v375_v31 = vmul.f32 %v3831_v27, %v4148_v28  ;;  %v4188_v32 = vadd.f32 %v395_v24, %v385_v26 }
 0x289   :  { %v376_v34 = vmul.f32 %v3833_v30, %v4142_v20  ;;  %v4194_v11 = vadd.f32 %v395_v24, %v386_v33 }
 0x28a   :  { %v408_v19 = vpack.c.bf16 %v4188_v32, %v4186_v12  ;;  %v387_v36 = vmul.f32 %v383_v16, %v375_v31 }
 0x28b   :  { %v3835_v37 = vpop.eup %3834  ;;  %v388_v40 = vmul.f32 %v383_v16, %v376_v34 }
 0x28c   :  { %v3837_v38 = vpop.eup %3836  ;;  %3456 = vmatprep.mubr.msk.bf16.mxu1 %vm197_vm0, %v408_v19  ;;  %v4196_v39 = vadd.f32 %v395_v24, %v387_v36  ;;  %v377_v28 = vmul.f32 %v3835_v37, %v4157_v35 }
 0x28d   :  { %v378_v41 = vmul.f32 %v3837_v38, %v4150_v29  ;;  %v4203_v47 = vadd.f32 %v395_v24, %v388_v40 }
 0x28e   :  { %v409_v20 = vpack.c.bf16 %v4196_v39, %v4194_v11  ;;  %v389_v44 = vmul.f32 %v383_v16, %v377_v28 }
 0x28f   :  { %v3839_v46 = vpop.eup %3838  ;;  %v390_v50 = vmul.f32 %v383_v16, %v378_v41 }
 0x290   :  { %3457 = vmatmul.mubr.msk.bf16.vlgmr.msra.gmra.mxu1 %vm197_vm0, %v409_v20  ;;  %v4205_v48 = vadd.f32 %v395_v24, %v389_v44  ;;  %v379_v49 = vmul.f32 %v3839_v46, %v4165_v42  ;;  %v415_v42 = vrot.slane %v4121_v45, %v414_v54 }
 0x291   :  { %v4211_v29 = vadd.f32 %v395_v24, %v390_v50 }
 0x292   :  { %v410_v35 = vpack.c.bf16 %v4205_v48, %v4203_v47  ;;  %v391_v51 = vmul.f32 %v383_v16, %v379_v49 }
 0x294   :  { %3460 = vmatprep.mubr.msk.bf16.mxu1 %vm197_vm0, %v410_v35  ;;  %v4213_v52 = vadd.f32 %v395_v24, %v391_v51 }
 0x296   :  { %v411_v53 = vpack.c.bf16 %v4213_v52, %v4211_v29 }
 0x298   :  { %3461 = vmatmul.mubr.msk.bf16.gmra.mxu1 %vm197_vm0, %v411_v53 }
 0x299   :  { %3472 = vmatprep.mubr.msk.bf16.mxu1 %vm4002_vm1, %v4001_v55 }
 0x350   :  { %v3458_v56 = vpop.f32.mrf.mxu1 }
 0x351   :  { %v483_v58 = vadd.f32 %v3458_v56, %v415_v42 }
 0x352   :  { %v474_v57 = vpop.f32.mrf.mxu1 }
 0x353   :  { %v475_v60 = vadd.f32 %v474_v57, %v415_v42  ;;  %v507_v63 = vmul.f32 0.35355338, %v483_v58 }
 0x354   :  { %v3459_v59 = vpop.f32.mrf.mxu1 }
 0x355   :  { %v486_v61 = vadd.f32 %v3459_v59, %v415_v42  ;;  %v505_v3 = vmul.f32 0.35355338, %v475_v60 }
 0x356   :  { %v477_v62 = vpop.f32.mrf.mxu1 }
 0x357   :  { %v508_v0 = vmul.f32 0.35355338, %v486_v61  ;;  %v4226_v1 = vpack.c.bf16 %v486_v61, %v483_v58  ;;  %v478_v2 = vadd.f32 %v477_v62, %v415_v42 }
 0x358   :  { %v3462_v45 = vpop.f32.mrf.mxu1 }
 0x359   :  { %v4228_v4 = vpack.c.bf16 %v508_v0, %v507_v63  ;;  %v506_v5 = vmul.f32 0.35355338, %v478_v2  ;;  %v4230_v6 = vpack.c.bf16 %v478_v2, %v475_v60  ;;  %573 = vrot.lane.b32.xlu1 %v4226_v1, %s4003_s2  ;;  %v499_v9 = vadd.f32 %v3462_v45, %v415_v42 }
 0x35a   :  { %v490_v7 = vpop.f32.mrf.mxu1 }
 0x35b   :  { %v4233_v8 = vpack.c.bf16 %v506_v5, %v505_v3  ;;  %522 = vrot.lane.b32.xlu0 %v4230_v6, %s4003_s2  ;;  %v491_v13 = vadd.f32 %v490_v7, %v415_v42  ;;  %v511_v16 = vmul.f32 0.35355338, %v499_v9 }
 0x35c   :  { %v3463_v10 = vpop.f32.mrf.mxu1 }
 0x35d   :  { %v502_v14 = vadd.f32 %v3463_v10, %v415_v42  ;;  %v509_v22 = vmul.f32 0.35355338, %v491_v13 }
 0x35e   :  { %v493_v15 = vpop.f32.mrf.mxu1 }
 0x35f   :  { %v512_v17 = vmul.f32 0.35355338, %v502_v14  ;;  %v4236_v18 = vpack.c.bf16 %v502_v14, %v499_v9  ;;  %v494_v21 = vadd.f32 %v493_v15, %v415_v42 }
 0x361   :  { %v4238_v23 = vpack.c.bf16 %v512_v17, %v511_v16  ;;  %v510_v24 = vmul.f32 0.35355338, %v494_v21  ;;  %v4240_v25 = vpack.c.bf16 %v494_v21, %v491_v13  ;;  %673 = vrot.lane.b32.xlu0 %v4236_v18, %s4003_s2 }
 0x363   :  { %v4243_v26 = vpack.c.bf16 %v510_v24, %v509_v22  ;;  %623 = vrot.lane.b32.xlu1 %v4240_v25, %s4003_s2 }
 0x3cb   :  { %v574_v27 = vpop.permute.xlu1 %573 }
 0x3cc   :  { %v579_v30 = vsel %vm524_vm2, %v574_v27, 0 }
 0x3cd   :  { %3471 = vmatpush3.bf16.xpose.msra.mxu1 %v579_v30  ;;  %v523_v31 = vpop.permute.xlu0 %522 }
 0x3ce   :  { %v529_v33 = vsel %vm524_vm2, %v523_v31, 0  ;;  %3482 = vmatprep.subr.bf16.mxu1 %v4001_v55 }
 0x3cf   :  { %3465 = vmatpush3.bf16.xpose.msra.mxu0 %v529_v33 }
 0x3d0   :  { %3476 = vmatprep.subr.bf16.mxu0 %v4001_v55 }
 0x3d3   :  { %v674_v34 = vpop.permute.xlu0 %673 }
 0x3d4   :  { %v679_v19 = vsel %vm524_vm2, %v674_v34, 0  ;;  %3473 = vmatmul.mubr.msk.bf16.vlgmr.msra.gmra.mxu1 %vm524_vm2, %v4228_v4 }
 0x3d5   :  { %v624_v36 = vpop.permute.xlu1 %623  ;;  %3483 = vmatpush3.bf16.xpose.msra.mxu1 %v679_v19  ;;  %3484 = vmatprep.mubr.msk.bf16.mxu1 %vm4002_vm1, %v4001_v55 }
 0x3d6   :  { %v629_v37 = vsel %vm524_vm2, %v624_v36, 0  ;;  %3467 = vmatmul.mubr.msk.bf16.vlgmr.msra.gmra.mxu0 %vm524_vm2, %v4233_v8  ;;  %3494 = vmatprep.subr.bf16.mxu1 %v4001_v55 }
 0x3d7   :  { %3477 = vmatpush3.bf16.xpose.msra.mxu0 %v629_v37  ;;  %3478 = vmatprep.mubr.msk.bf16.mxu0 %vm4002_vm1, %v4001_v55 }
 0x3d8   :  { %3488 = vmatprep.subr.bf16.mxu0 %v4001_v55 }
 0x3dc   :  { %3485 = vmatmul.mubr.msk.bf16.vlgmr.msra.gmra.mxu1 %vm524_vm2, %v4238_v23 }
 0x3dd   :  { %3496 = vmatprep.mubr.msk.bf16.mxu1 %vm4002_vm1, %v4001_v55 }
 0x3de   :  { %3479 = vmatmul.mubr.msk.bf16.vlgmr.msra.gmra.mxu0 %vm524_vm2, %v4243_v26 }
 0x3df   :  { %3490 = vmatprep.mubr.msk.bf16.mxu0 %vm4002_vm1, %v4001_v55 }
 0x494   :  { %v615_v38 = vpop.f32.mrf.mxu1 }
 0x495   :  { %v729_v56 = vsel %vm722_vm3, %v615_v38, -inf }
 0x496   :  { %v565_v28 = vpop.f32.mrf.mxu0  ;;  %v3474_v40 = vpop.f32.mrf.mxu1 }
 0x497   :  { %v723_v41 = vsel %vm722_vm3, %v565_v28, -inf }
 0x498   :  { %v618_v20 = vpop.f32.mrf.mxu1  ;;  %724 = vmax.xlane.f32.xlu1 %v723_v41  ;;  %v3468_v44 = vpop.f32.mrf.mxu0 }
 0x499   :  { %v732_v50 = vsel %vm722_vm3, %v618_v20, -inf }
 0x49a   :  { %v568_v46 = vpop.f32.mrf.mxu0  ;;  %v3475_v49 = vpop.f32.mrf.mxu1 }
 0x49b   :  { %v726_v35 = vsel %vm722_vm3, %v568_v46, -inf }
 0x49c   :  { %733 = vmax.xlane.f32.xlu1 %v732_v50  ;;  %727 = vmax.xlane.f32.xlu0 %v726_v35  ;;  %v3469_v51 = vpop.f32.mrf.mxu0  ;;  %v715_v53 = vpop.f32.mrf.mxu1 }
 0x49d   :  { %v741_v0 = vsel %vm722_vm3, %v715_v53, -inf }
 0x49e   :  { %v665_v54 = vpop.f32.mrf.mxu0  ;;  %v3486_v42 = vpop.f32.mrf.mxu1 }
 0x49f   :  { %v735_v61 = vsel %vm722_vm3, %v665_v54, -inf }
 0x4a0   :  { %730 = vmax.xlane.f32.xlu0 %v729_v56  ;;  %v3480_v57 = vpop.f32.mrf.mxu0  ;;  %v718_v58 = vpop.f32.mrf.mxu1 }
 0x4a1   :  { %v744_v2 = vsel %vm722_vm3, %v718_v58, -inf }
 0x4a2   :  { %v668_v59 = vpop.f32.mrf.mxu0  ;;  %v3487_v60 = vpop.f32.mrf.mxu1 }
 0x4a3   :  { %v738_v62 = vsel %vm722_vm3, %v668_v59, -inf }
 0x4a4   :  { %736 = vmax.xlane.f32.xlu0 %v735_v61  ;;  %739 = vmax.xlane.f32.xlu1 %v738_v62  ;;  %v3481_v63 = vpop.f32.mrf.mxu0 }
 0x4a8   :  { %742 = vmax.xlane.f32.xlu0 %v741_v0  ;;  %745 = vmax.xlane.f32.xlu1 %v744_v2 }
 0x4b9   :  { %862 = vrot.lane.b32.xlu1 %v4226_v1, %s4004_s18 }
 0x4bd   :  { %909 = vrot.lane.b32.xlu1 %v4240_v25, %s4004_s18 }
 0x4be   :  { %815 = vrot.lane.b32.xlu0 %v4230_v6, %s4004_s18 }
 0x4c1   :  { %1006 = vrot.lane.b32.xlu1 %v4230_v6, %s4005_s19 }
 0x4c2   :  { %956 = vrot.lane.b32.xlu0 %v4236_v18, %s4004_s18 }
 0x521   :  { %v725_v45 = vpop.xlane.xlu1 %724 }
 0x522   :  { %v747_v10 = vsub.f32 %v565_v28, %v725_v45 }
 0x524   :  { %v755_v17 = vmul.f32 1.442695, %v747_v10 }
 0x525   :  { %v734_v3 = vpop.xlane.xlu1 %733  ;;  %v728_v5 = vpop.xlane.xlu0 %727 }
 0x526   :  { %v750_v7 = vsub.f32 %v618_v20, %v734_v3  ;;  %v748_v9 = vsub.f32 %v568_v46, %v728_v5 }
 0x528   :  { %v761_v13 = vmul.f32 1.442695, %v750_v7  ;;  %v757_v14 = vmul.f32 1.442695, %v748_v9 }
 0x529   :  { %v731_v15 = vpop.xlane.xlu0 %730 }
 0x52a   :  { %3840 = vpow2.f32 %v761_v13  ;;  %v749_v16 = vsub.f32 %v615_v38, %v731_v15 }
 0x52b   :  { %3842 = vpow2.f32 %v757_v14 }
 0x52c   :  { %v759_v21 = vmul.f32 1.442695, %v749_v16 }
 0x52d   :  { %v740_v22 = vpop.xlane.xlu1 %739  ;;  %v737_v24 = vpop.xlane.xlu0 %736 }
 0x52e   :  { %3844 = vpow2.f32 %v759_v21  ;;  %v752_v27 = vsub.f32 %v668_v59, %v740_v22  ;;  %v751_v30 = vsub.f32 %v665_v54, %v737_v24 }
 0x52f   :  { %3846 = vpow2.f32 %v755_v17 }
 0x530   :  { %v765_v36 = vmul.f32 1.442695, %v752_v27  ;;  %v763_v40 = vmul.f32 1.442695, %v751_v30 }
 0x531   :  { %v746_v31 = vpop.xlane.xlu1 %745  ;;  %v743_v33 = vpop.xlane.xlu0 %742 }
 0x532   :  { %v754_v34 = vsub.f32 %v718_v58, %v746_v31  ;;  %v753_v19 = vsub.f32 %v715_v53, %v743_v33 }
 0x534   :  { %v769_v37 = vmul.f32 1.442695, %v754_v34  ;;  %v767_v28 = vmul.f32 1.442695, %v753_v19 }
 0x535   :  { %v863_v41 = vpop.permute.xlu1 %862  ;;  %v816_v20 = vpop.permute.xlu0 %815 }
 0x536   :  { %3848 = vpow2.f32 %v769_v37  ;;  %3489 = vmatpush3.bf16.msra.mxu0 %v816_v20  ;;  %3495 = vmatpush3.bf16.msra.mxu1 %v863_v41 }
 0x537   :  { %v3841_v38 = vpop.eup %3840  ;;  %3850 = vpow2.f32 %v767_v28  ;;  %3506 = vmatprep.subr.bf16.mxu1 %v4001_v55  ;;  %3500 = vmatprep.subr.bf16.mxu0 %v4001_v55 }
 0x538   :  { %3852 = vpow2.f32 %v765_v36  ;;  %v780_v44 = vsel %vm722_vm3, %v3841_v38, 0.0  ;;  %v3843_v46 = vpop.eup %3842 }
 0x539   :  { %3854 = vpow2.f32 %v763_v40  ;;  %781 = vadd.xlane.f32.xlu1 %v780_v44  ;;  %v774_v50 = vsel %vm722_vm3, %v3843_v46, 0.0  ;;  %v910_v62 = vpop.permute.xlu1 %909  ;;  %v957_v0 = vpop.permute.xlu0 %956 }
 0x53b   :  { %v3845_v49 = vpop.eup %3844 }
 0x53c   :  { %v777_v35 = vsel %vm722_vm3, %v3845_v49, 0.0  ;;  %v3847_v51 = vpop.eup %3846 }
 0x53d   :  { %775 = vadd.xlane.f32.xlu1 %v774_v50  ;;  %778 = vadd.xlane.f32.xlu0 %v777_v35  ;;  %v771_v53 = vsel %vm722_vm3, %v3847_v51, 0.0  ;;  %v1007_v63 = vpop.permute.xlu1 %1006 }
 0x53e   :  { %v1012_v35 = vsel %vm524_vm2, %v1007_v63, 0 }
 0x541   :  { %772 = vadd.xlane.f32.xlu0 %v771_v53 }
 0x543   :  { %v3849_v54 = vpop.eup %3848 }
 0x544   :  { %v3851_v42 = vpop.eup %3850  ;;  %v792_v56 = vsel %vm722_vm3, %v3849_v54, 0.0 }
 0x545   :  { %v4291_v57 = vpop.eup %3852  ;;  %793 = vadd.xlane.f32.xlu1 %v792_v56  ;;  %v789_v58 = vsel %vm722_vm3, %v3851_v42, 0.0 }
 0x546   :  { %v4294_v59 = vpop.eup %3854  ;;  %790 = vadd.xlane.f32.xlu0 %v789_v58  ;;  %v786_v60 = vsel %vm722_vm3, %v4291_v57, 0.0 }
 0x547   :  { %v783_v61 = vsel %vm722_vm3, %v4294_v59, 0.0 }
 0x549   :  { %787 = vadd.xlane.f32.xlu1 %v786_v60 }
 0x54a   :  { %784 = vadd.xlane.f32.xlu0 %v783_v61 }
 0x55a   :  { %1004 = vrot.lane.b32.xlu1 %v4233_v8, %s4006_s20 }
 0x55e   :  { %1056 = vrot.lane.b32.xlu1 %v4228_v4, %s4006_s20 }
 0x560   :  { %1058 = vrot.lane.b32.xlu0 %v4226_v1, %s4005_s19 }
 0x562   :  { %1108 = vrot.lane.b32.xlu1 %v4243_v26, %s4006_s20 }
 0x564   :  { %1110 = vrot.lane.b32.xlu0 %v4240_v25, %s4005_s19 }
 0x568   :  { %1162 = vrot.lane.b32.xlu0 %v4236_v18, %s4005_s19 }
 0x56c   :  { %1160 = vrot.lane.b32.xlu0 %v4238_v23, %s4006_s20 }
 0x5c2   :  { %v782_v2 = vpop.xlane.xlu1 %781 }
 0x5c3   :  { %3856 = vrcp.f32 %v782_v2 }
 0x5c6   :  { %v776_v45 = vpop.xlane.xlu1 %775  ;;  %v779_v3 = vpop.xlane.xlu0 %778 }
 0x5c7   :  { %3858 = vrcp.f32 %v779_v3 }
 0x5c8   :  { %3860 = vrcp.f32 %v776_v45 }
 0x5ca   :  { %v773_v5 = vpop.xlane.xlu0 %772 }
 0x5cb   :  { %3862 = vrcp.f32 %v773_v5 }
 0x5ce   :  { %v794_v7 = vpop.xlane.xlu1 %793 }
 0x5cf   :  { %3864 = vrcp.f32 %v794_v7  ;;  %v791_v9 = vpop.xlane.xlu0 %790 }
 0x5d0   :  { %3866 = vrcp.f32 %v791_v9  ;;  %v3857_v13 = vpop.eup %3856 }
 0x5d1   :  { %v806_v21 = vmul.f32 %v3857_v13, %v3841_v38 }
 0x5d2   :  { %v788_v10 = vpop.xlane.xlu1 %787 }
 0x5d3   :  { %3868 = vrcp.f32 %v788_v10  ;;  %v785_v14 = vpop.xlane.xlu0 %784 }
 0x5d4   :  { %3870 = vrcp.f32 %v785_v14  ;;  %v3859_v15 = vpop.eup %3858 }
 0x5d5   :  { %v3861_v16 = vpop.eup %3860  ;;  %v805_v17 = vmul.f32 %v3859_v15, %v3845_v49 }
 0x5d6   :  { %v804_v30 = vmul.f32 %v3861_v16, %v3843_v46  ;;  %v1005_v49 = vpop.permute.xlu1 %1004 }
 0x5d7   :  { %v812_v24 = vpack.c.bf16 %v806_v21, %v805_v17  ;;  %v1059_v31 = vpop.permute.xlu0 %1058 }
 0x5d8   :  { %v3863_v22 = vpop.eup %3862  ;;  %v1064_v44 = vsel %vm524_vm2, %v1059_v31, 0 }
 0x5d9   :  { %v803_v27 = vmul.f32 %v3863_v22, %v3847_v51  ;;  %3497 = vmatmul.mubr.msk.bf16.vlgmr.msra.gmra.mxu1 %vm722_vm3, %v812_v24 }
 0x5da   :  { %3507 = vmatpush3.bf16.msra.mxu1 %v957_v0  ;;  %3508 = vmatprep.mubr.msk.bf16.mxu1 %vm4002_vm1, %v4001_v55  ;;  %v1057_v53 = vpop.permute.xlu1 %1056 }
 0x5db   :  { %v811_v33 = vpack.c.bf16 %v804_v30, %v803_v27  ;;  %3518 = vmatprep.subr.bf16.mxu1 %v4001_v55  ;;  %v1111_v20 = vpop.permute.xlu0 %1110 }
 0x5dc   :  { %v3865_v34 = vpop.eup %3864 }
 0x5dd   :  { %v3867_v19 = vpop.eup %3866  ;;  %3491 = vmatmul.mubr.msk.bf16.vlgmr.msra.gmra.mxu0 %vm722_vm3, %v811_v33  ;;  %v810_v36 = vmul.f32 %v3865_v34, %v3849_v54 }
 0x5de   :  { %3501 = vmatpush3.bf16.msra.mxu0 %v910_v62  ;;  %v809_v37 = vmul.f32 %v3867_v19, %v3851_v42  ;;  %3502 = vmatprep.mubr.msk.bf16.mxu0 %vm4002_vm1, %v4001_v55  ;;  %v1116_v42 = vsel %vm524_vm2, %v1111_v20, 0 }
 0x5df   :  { %3512 = vmatprep.subr.bf16.mxu0 %v4001_v55  ;;  %v1163_v51 = vpop.permute.xlu0 %1162 }
 0x5e0   :  { %v3869_v28 = vpop.eup %3868  ;;  %v814_v40 = vpack.c.bf16 %v810_v36, %v809_v37  ;;  %v1168_v54 = vsel %vm524_vm2, %v1163_v51, 0 }
 0x5e1   :  { %v3871_v41 = vpop.eup %3870  ;;  %v808_v38 = vmul.f32 %v3869_v28, %v4291_v57  ;;  %v1109_v57 = vpop.permute.xlu1 %1108 }
 0x5e2   :  { %3509 = vmatmul.mubr.msk.bf16.vlgmr.msra.gmra.mxu1 %vm722_vm3, %v814_v40  ;;  %v807_v46 = vmul.f32 %v3871_v41, %v4294_v59 }
 0x5e3   :  { %3519 = vmatpush3.bf16.xpose.msra.mxu1 %v1064_v44  ;;  %3520 = vmatprep.mubr.msk.bf16.mxu1 %vm4002_vm1, %v4001_v55  ;;  %v1161_v56 = vpop.permute.xlu0 %1160 }
 0x5e4   :  { %v813_v50 = vpack.c.bf16 %v808_v38, %v807_v46  ;;  %3530 = vmatprep.subr.bf16.mxu1 %v4001_v55 }
 0x5e6   :  { %3503 = vmatmul.mubr.msk.bf16.vlgmr.msra.gmra.mxu0 %vm722_vm3, %v813_v50 }
 0x5e7   :  { %3513 = vmatpush3.bf16.xpose.msra.mxu0 %v1012_v35  ;;  %3514 = vmatprep.mubr.msk.bf16.mxu0 %vm4002_vm1, %v4001_v55 }
 0x5e8   :  { %3524 = vmatprep.subr.bf16.mxu0 %v4001_v55 }
 0x5ea   :  { %3521 = vmatmul.mubr.msk.bf16.vlgmr.msra.gmra.mxu1 %vm524_vm2, %v1057_v53 }
 0x5eb   :  { %3531 = vmatpush3.bf16.xpose.msra.mxu1 %v1168_v54  ;;  %3532 = vmatprep.mubr.msk.bf16.mxu1 %vm4002_vm1, %v4001_v55 }
 0x5ec   :  { %3542 = vmatprep.subr.bf16.mxu1 %v4001_v55 }
 0x5ee   :  { %3515 = vmatmul.mubr.msk.bf16.vlgmr.msra.gmra.mxu0 %vm524_vm2, %v1005_v49 }
 0x5ef   :  { %3525 = vmatpush3.bf16.xpose.msra.mxu0 %v1116_v42  ;;  %3526 = vmatprep.mubr.msk.bf16.mxu0 %vm4002_vm1, %v4001_v55 }
 0x5f0   :  { %3536 = vmatprep.subr.bf16.mxu0 %v4001_v55 }
 0x5f2   :  { %3533 = vmatmul.mubr.msk.bf16.vlgmr.msra.gmra.mxu1 %vm524_vm2, %v1161_v56 }
 0x5f3   :  { %3544 = vmatprep.mubr.msk.bf16.mxu1 %vm4002_vm1, %v4001_v55 }
 0x5f6   :  { %3527 = vmatmul.mubr.msk.bf16.vlgmr.msra.gmra.mxu0 %vm524_vm2, %v1109_v57 }
 0x5f7   :  { %3538 = vmatprep.mubr.msk.bf16.mxu0 %vm4002_vm1, %v4001_v55 }
 0x699   :  { %v4346_v58 = vpop.f32.mrf.mxu1 }
 0x69b   :  { %v3498_v59 = vpop.f32.mrf.mxu1 }
 0x69d   :  { %v4348_v60 = vpop.f32.mrf.mxu0  ;;  %v4350_v61 = vpop.f32.mrf.mxu1 }
 0x69f   :  { %v3492_v62 = vpop.f32.mrf.mxu0  ;;  %v3499_v63 = vpop.f32.mrf.mxu1 }
 0x6a1   :  { %v4352_v0 = vpop.f32.mrf.mxu0 }
 0x6a2   :  { %v4354_v2 = vpop.f32.mrf.mxu1 }
 0x6a3   :  { %v3493_v45 = vpop.f32.mrf.mxu0 }
 0x6a4   :  { %v3510_v3 = vpop.f32.mrf.mxu1 }
 0x6a6   :  { %v4356_v5 = vpop.f32.mrf.mxu0  ;;  %v4358_v7 = vpop.f32.mrf.mxu1 }
 0x6a8   :  { %v3504_v9 = vpop.f32.mrf.mxu0  ;;  %v3511_v10 = vpop.f32.mrf.mxu1 }
 0x6aa   :  { %v4360_v13 = vpop.f32.mrf.mxu0  ;;  %v1100_v14 = vpop.f32.mrf.mxu1 }
 0x6ab   :  { %v1217_v40 = vsel %vm722_vm3, %v1100_v14, -inf }
 0x6ac   :  { %v3505_v15 = vpop.f32.mrf.mxu0  ;;  %v3522_v16 = vpop.f32.mrf.mxu1 }
 0x6ae   :  { %v1048_v17 = vpop.f32.mrf.mxu0  ;;  %v1103_v21 = vpop.f32.mrf.mxu1 }
 0x6af   :  { %v1211_v22 = vsel %vm722_vm3, %v1048_v17, -inf  ;;  %v1220_v34 = vsel %vm722_vm3, %v1103_v21, -inf }
 0x6b0   :  { %1212 = vmax.xlane.f32.xlu1 %v1211_v22  ;;  %v3516_v24 = vpop.f32.mrf.mxu0  ;;  %v3523_v27 = vpop.f32.mrf.mxu1 }
 0x6b2   :  { %v1051_v30 = vpop.f32.mrf.mxu0  ;;  %v1204_v31 = vpop.f32.mrf.mxu1 }
 0x6b3   :  { %v1214_v33 = vsel %vm722_vm3, %v1051_v30, -inf  ;;  %v1229_v50 = vsel %vm722_vm3, %v1204_v31, -inf }
 0x6b4   :  { %1215 = vmax.xlane.f32.xlu0 %v1214_v33  ;;  %v3517_v19 = vpop.f32.mrf.mxu0  ;;  %1221 = vmax.xlane.f32.xlu1 %v1220_v34  ;;  %v3534_v36 = vpop.f32.mrf.mxu1 }
 0x6b6   :  { %v1152_v37 = vpop.f32.mrf.mxu0  ;;  %v1207_v28 = vpop.f32.mrf.mxu1 }
 0x6b7   :  { %v1223_v44 = vsel %vm722_vm3, %v1152_v37, -inf  ;;  %v1232_v35 = vsel %vm722_vm3, %v1207_v28, -inf }
 0x6b8   :  { %1218 = vmax.xlane.f32.xlu0 %v1217_v40  ;;  %v3528_v41 = vpop.f32.mrf.mxu0  ;;  %v3535_v20 = vpop.f32.mrf.mxu1 }
 0x6ba   :  { %v1155_v38 = vpop.f32.mrf.mxu0 }
 0x6bb   :  { %v1226_v46 = vsel %vm722_vm3, %v1155_v38, -inf }
 0x6bc   :  { %1224 = vmax.xlane.f32.xlu0 %v1223_v44  ;;  %1227 = vmax.xlane.f32.xlu1 %v1226_v46  ;;  %v3529_v49 = vpop.f32.mrf.mxu0 }
 0x6c0   :  { %1230 = vmax.xlane.f32.xlu0 %v1229_v50  ;;  %1233 = vmax.xlane.f32.xlu1 %v1232_v35 }
 0x6d1   :  { %1350 = vrot.lane.b32.xlu1 %v4226_v1, %s4007_s21 }
 0x6d5   :  { %1397 = vrot.lane.b32.xlu1 %v4240_v25, %s4007_s21 }
 0x6d6   :  { %1303 = vrot.lane.b32.xlu0 %v4230_v6, %s4007_s21 }
 0x6d9   :  { %1493 = vrot.lane.b32.xlu1 %v4230_v6, %s4008_s22 }
 0x6da   :  { %1444 = vrot.lane.b32.xlu0 %v4236_v18, %s4007_s21 }
 0x739   :  { %v1213_v51 = vpop.xlane.xlu1 %1212 }
 0x73a   :  { %v1235_v57 = vsub.f32 %v1048_v17, %v1213_v51 }
 0x73c   :  { %v1243_v3 = vmul.f32 1.442695, %v1235_v57 }
 0x73d   :  { %v1222_v53 = vpop.xlane.xlu1 %1221  ;;  %v1216_v54 = vpop.xlane.xlu0 %1215 }
 0x73e   :  { %v1238_v42 = vsub.f32 %v1103_v21, %v1222_v53  ;;  %v1236_v56 = vsub.f32 %v1051_v30, %v1216_v54 }
 0x740   :  { %v1249_v59 = vmul.f32 1.442695, %v1238_v42  ;;  %v1245_v62 = vmul.f32 1.442695, %v1236_v56 }
 0x741   :  { %v1219_v63 = vpop.xlane.xlu0 %1218 }
 0x742   :  { %3872 = vpow2.f32 %v1249_v59  ;;  %v1237_v45 = vsub.f32 %v1100_v14, %v1219_v63 }
 0x743   :  { %3874 = vpow2.f32 %v1245_v62 }
 0x744   :  { %v1247_v9 = vmul.f32 1.442695, %v1237_v45 }
 0x745   :  { %v1228_v10 = vpop.xlane.xlu1 %1227  ;;  %v1225_v15 = vpop.xlane.xlu0 %1224 }
 0x746   :  { %3876 = vpow2.f32 %v1247_v9  ;;  %v1240_v16 = vsub.f32 %v1155_v38, %v1228_v10  ;;  %v1239_v22 = vsub.f32 %v1152_v37, %v1225_v15 }
 0x747   :  { %3878 = vpow2.f32 %v1243_v3 }
 0x748   :  { %v1253_v30 = vmul.f32 1.442695, %v1240_v16  ;;  %v1251_v19 = vmul.f32 1.442695, %v1239_v22 }
 0x749   :  { %v1234_v24 = vpop.xlane.xlu1 %1233  ;;  %v1231_v27 = vpop.xlane.xlu0 %1230 }
 0x74a   :  { %v1242_v33 = vsub.f32 %v1207_v28, %v1234_v24  ;;  %v1241_v21 = vsub.f32 %v1204_v31, %v1231_v27 }
 0x74c   :  { %v1257_v17 = vmul.f32 1.442695, %v1242_v33  ;;  %v1255_v34 = vmul.f32 1.442695, %v1241_v21 }
 0x74d   :  { %v1351_v36 = vpop.permute.xlu1 %1350  ;;  %v1304_v40 = vpop.permute.xlu0 %1303 }
 0x74e   :  { %3880 = vpow2.f32 %v1257_v17  ;;  %3537 = vmatpush3.bf16.msra.mxu0 %v1304_v40  ;;  %3543 = vmatpush3.bf16.msra.mxu1 %v1351_v36 }
 0x74f   :  { %v3873_v14 = vpop.eup %3872  ;;  %3882 = vpow2.f32 %v1255_v34  ;;  %3554 = vmatprep.subr.bf16.mxu1 %v4001_v55  ;;  %3548 = vmatprep.subr.bf16.mxu0 %v4001_v55 }
 0x750   :  { %3884 = vpow2.f32 %v1253_v30  ;;  %v1268_v37 = vsel %vm722_vm3, %v3873_v14, 0.0  ;;  %v3875_v28 = vpop.eup %3874 }
 0x751   :  { %3886 = vpow2.f32 %v1251_v19  ;;  %1269 = vadd.xlane.f32.xlu1 %v1268_v37  ;;  %v1262_v41 = vsel %vm722_vm3, %v3875_v28, 0.0  ;;  %v1398_v56 = vpop.permute.xlu1 %1397  ;;  %v1445_v59 = vpop.permute.xlu0 %1444 }
 0x753   :  { %v3877_v31 = vpop.eup %3876 }
 0x754   :  { %v1265_v20 = vsel %vm722_vm3, %v3877_v31, 0.0  ;;  %v3879_v38 = vpop.eup %3878 }
 0x755   :  { %1263 = vadd.xlane.f32.xlu1 %v1262_v41  ;;  %1266 = vadd.xlane.f32.xlu0 %v1265_v20  ;;  %v1259_v44 = vsel %vm722_vm3, %v3879_v38, 0.0  ;;  %v1494_v57 = vpop.permute.xlu1 %1493 }
 0x759   :  { %1260 = vadd.xlane.f32.xlu0 %v1259_v44 }
 0x75b   :  { %v3881_v46 = vpop.eup %3880 }
 0x75c   :  { %v3883_v49 = vpop.eup %3882  ;;  %v1280_v50 = vsel %vm722_vm3, %v3881_v46, 0.0 }
 0x75d   :  { %v4383_v35 = vpop.eup %3884  ;;  %1281 = vadd.xlane.f32.xlu1 %v1280_v50  ;;  %v1277_v51 = vsel %vm722_vm3, %v3883_v49, 0.0 }
 0x75e   :  { %v4386_v53 = vpop.eup %3886  ;;  %1278 = vadd.xlane.f32.xlu0 %v1277_v51  ;;  %v1274_v54 = vsel %vm722_vm3, %v4383_v35, 0.0 }
 0x75f   :  { %v1271_v42 = vsel %vm722_vm3, %v4386_v53, 0.0 }
 0x761   :  { %1275 = vadd.xlane.f32.xlu1 %v1274_v54 }
 0x762   :  { %1272 = vadd.xlane.f32.xlu0 %v1271_v42  ;;  %v1499_v42 = vsel %vm524_vm2, %v1494_v57, 0 }
 0x772   :  { %1491 = vrot.lane.b32.xlu1 %v4233_v8, %s4009_s23 }
 0x776   :  { %1542 = vrot.lane.b32.xlu1 %v4228_v4, %s4009_s23 }
 0x778   :  { %1544 = vrot.lane.b32.xlu0 %v4226_v1, %s4008_s22 }
 0x77a   :  { %1593 = vrot.lane.b32.xlu1 %v4243_v26, %s4009_s23 }
 0x77c   :  { %1595 = vrot.lane.b32.xlu0 %v4240_v25, %s4008_s22 }
 0x780   :  { %1646 = vrot.lane.b32.xlu0 %v4236_v18, %s4008_s22 }
 0x784   :  { %1644 = vrot.lane.b32.xlu0 %v4238_v23, %s4009_s23 }
 0x7da   :  { %v1270_v62 = vpop.xlane.xlu1 %1269 }
 0x7db   :  { %3888 = vrcp.f32 %v1270_v62 }
 0x7de   :  { %v1264_v63 = vpop.xlane.xlu1 %1263  ;;  %v1267_v45 = vpop.xlane.xlu0 %1266 }
 0x7df   :  { %3890 = vrcp.f32 %v1267_v45 }
 0x7e0   :  { %3892 = vrcp.f32 %v1264_v63 }
 0x7e2   :  { %v1261_v3 = vpop.xlane.xlu0 %1260 }
 0x7e3   :  { %3894 = vrcp.f32 %v1261_v3 }
 0x7e6   :  { %v1282_v9 = vpop.xlane.xlu1 %1281 }
 0x7e7   :  { %3896 = vrcp.f32 %v1282_v9  ;;  %v1279_v10 = vpop.xlane.xlu0 %1278 }
 0x7e8   :  { %3898 = vrcp.f32 %v1279_v10  ;;  %v3889_v16 = vpop.eup %3888 }
 0x7e9   :  { %v1294_v21 = vmul.f32 %v3889_v16, %v3873_v14 }
 0x7ea   :  { %v1276_v15 = vpop.xlane.xlu1 %1275 }
 0x7eb   :  { %3900 = vrcp.f32 %v1276_v15  ;;  %v1273_v22 = vpop.xlane.xlu0 %1272 }
 0x7ec   :  { %3902 = vrcp.f32 %v1273_v22  ;;  %v3891_v24 = vpop.eup %3890 }
 0x7ed   :  { %v3893_v27 = vpop.eup %3892  ;;  %v1293_v33 = vmul.f32 %v3891_v24, %v3877_v31 }
 0x7ee   :  { %v1292_v19 = vmul.f32 %v3893_v27, %v3875_v28 }
 0x7ef   :  { %v1300_v17 = vpack.c.bf16 %v1294_v21, %v1293_v33  ;;  %v1545_v36 = vpop.permute.xlu0 %1544 }
 0x7f0   :  { %v3895_v30 = vpop.eup %3894  ;;  %v1550_v51 = vsel %vm524_vm2, %v1545_v36, 0 }
 0x7f1   :  { %v1291_v34 = vmul.f32 %v3895_v30, %v3879_v38  ;;  %3545 = vmatmul.mubr.msk.bf16.vlgmr.msra.gmra.mxu1 %vm722_vm3, %v1300_v17 }
 0x7f2   :  { %3555 = vmatpush3.bf16.msra.mxu1 %v1445_v59  ;;  %3556 = vmatprep.mubr.msk.bf16.mxu1 %vm4002_vm1, %v4001_v55 }
 0x7f3   :  { %v1299_v40 = vpack.c.bf16 %v1292_v19, %v1291_v34  ;;  %3566 = vmatprep.subr.bf16.mxu1 %v4001_v55  ;;  %v1596_v44 = vpop.permute.xlu0 %1595 }
 0x7f4   :  { %v3897_v37 = vpop.eup %3896  ;;  %v1601_v57 = vsel %vm524_vm2, %v1596_v44, 0 }
 0x7f5   :  { %v3899_v41 = vpop.eup %3898  ;;  %3539 = vmatmul.mubr.msk.bf16.vlgmr.msra.gmra.mxu0 %vm722_vm3, %v1299_v40  ;;  %v1298_v31 = vmul.f32 %v3897_v37, %v3881_v46  ;;  %v1492_v46 = vpop.permute.xlu1 %1491 }
 0x7f6   :  { %3549 = vmatpush3.bf16.msra.mxu0 %v1398_v56  ;;  %v1297_v14 = vmul.f32 %v3899_v41, %v3883_v49  ;;  %3550 = vmatprep.mubr.msk.bf16.mxu0 %vm4002_vm1, %v4001_v55 }
 0x7f7   :  { %3560 = vmatprep.subr.bf16.mxu0 %v4001_v55  ;;  %v1647_v56 = vpop.permute.xlu0 %1646 }
 0x7f8   :  { %v3901_v28 = vpop.eup %3900  ;;  %v1302_v20 = vpack.c.bf16 %v1298_v31, %v1297_v14 }
 0x7f9   :  { %v3903_v38 = vpop.eup %3902  ;;  %v1296_v50 = vmul.f32 %v3901_v28, %v4383_v35  ;;  %v1543_v35 = vpop.permute.xlu1 %1542 }
 0x7fa   :  { %3557 = vmatmul.mubr.msk.bf16.vlgmr.msra.gmra.mxu1 %vm722_vm3, %v1302_v20  ;;  %v1295_v54 = vmul.f32 %v3903_v38, %v4386_v53  ;;  %v1652_v53 = vsel %vm524_vm2, %v1647_v56, 0 }
 0x7fb   :  { %3567 = vmatpush3.bf16.xpose.msra.mxu1 %v1550_v51  ;;  %3568 = vmatprep.mubr.msk.bf16.mxu1 %vm4002_vm1, %v4001_v55  ;;  %v1645_v59 = vpop.permute.xlu0 %1644 }
 0x7fc   :  { %v1301_v49 = vpack.c.bf16 %v1296_v50, %v1295_v54  ;;  %3578 = vmatprep.subr.bf16.mxu1 %v4001_v55 }
 0x7fd   :  { %v1594_v62 = vpop.permute.xlu1 %1593 }
 0x7fe   :  { %3551 = vmatmul.mubr.msk.bf16.vlgmr.msra.gmra.mxu0 %vm722_vm3, %v1301_v49 }
 0x7ff   :  { %3561 = vmatpush3.bf16.xpose.msra.mxu0 %v1499_v42  ;;  %3562 = vmatprep.mubr.msk.bf16.mxu0 %vm4002_vm1, %v4001_v55 }
 0x800   :  { %3572 = vmatprep.subr.bf16.mxu0 %v4001_v55 }
 0x802   :  { %3569 = vmatmul.mubr.msk.bf16.vlgmr.msra.gmra.mxu1 %vm524_vm2, %v1543_v35 }
 0x803   :  { %3579 = vmatpush3.bf16.xpose.msra.mxu1 %v1652_v53  ;;  %3580 = vmatprep.mubr.msk.bf16.mxu1 %vm4002_vm1, %v4001_v55 }
 0x804   :  { %3590 = vmatprep.subr.bf16.mxu1 %v4001_v55 }
 0x806   :  { %3563 = vmatmul.mubr.msk.bf16.vlgmr.msra.gmra.mxu0 %vm524_vm2, %v1492_v46 }
 0x807   :  { %3573 = vmatpush3.bf16.xpose.msra.mxu0 %v1601_v57  ;;  %3574 = vmatprep.mubr.msk.bf16.mxu0 %vm4002_vm1, %v4001_v55 }
 0x808   :  { %3584 = vmatprep.subr.bf16.mxu0 %v4001_v55 }
 0x80a   :  { %3581 = vmatmul.mubr.msk.bf16.vlgmr.msra.gmra.mxu1 %vm524_vm2, %v1645_v59 }
 0x80b   :  { %3592 = vmatprep.mubr.msk.bf16.mxu1 %vm4002_vm1, %v4001_v55 }
 0x80e   :  { %3575 = vmatmul.mubr.msk.bf16.vlgmr.msra.gmra.mxu0 %vm524_vm2, %v1594_v62 }
 0x80f   :  { %3586 = vmatprep.mubr.msk.bf16.mxu0 %vm4002_vm1, %v4001_v55 }
 0x8b1   :  { %v4438_v63 = vpop.f32.mrf.mxu1 }
 0x8b3   :  { %v3546_v45 = vpop.f32.mrf.mxu1 }
 0x8b5   :  { %v4440_v3 = vpop.f32.mrf.mxu0  ;;  %v4442_v9 = vpop.f32.mrf.mxu1 }
 0x8b7   :  { %v3540_v15 = vpop.f32.mrf.mxu0  ;;  %v3547_v16 = vpop.f32.mrf.mxu1 }
 0x8b9   :  { %v4446_v22 = vpop.f32.mrf.mxu0 }
 0x8ba   :  { %v3752_v24 = vpack.i.bf16 %v4446_v22, %v4440_v3  ;;  %v4450_v27 = vpop.f32.mrf.mxu1 }
 0x8bb   :  { %v3541_v33 = vpop.f32.mrf.mxu0 }
 0x8bc   :  { %v3558_v21 = vpop.f32.mrf.mxu1 }
 0x8be   :  { %v4452_v30 = vpop.f32.mrf.mxu0  ;;  %v4454_v17 = vpop.f32.mrf.mxu1 }
 0x8c0   :  { %v3552_v19 = vpop.f32.mrf.mxu0  ;;  %v3559_v36 = vpop.f32.mrf.mxu1 }
 0x8c2   :  { %v4458_v40 = vpop.f32.mrf.mxu0  ;;  %v1586_v37 = vpop.f32.mrf.mxu1 }
 0x8c3   :  { %v1701_v57 = vsel %vm722_vm3, %v1586_v37, -inf }
 0x8c4   :  { %v3553_v31 = vpop.f32.mrf.mxu0  ;;  %v3570_v14 = vpop.f32.mrf.mxu1 }
 0x8c6   :  { %v1535_v28 = vpop.f32.mrf.mxu0  ;;  %v1589_v20 = vpop.f32.mrf.mxu1 }
 0x8c7   :  { %v1695_v38 = vsel %vm722_vm3, %v1535_v28, -inf  ;;  %v1704_v49 = vsel %vm722_vm3, %v1589_v20, -inf }
 0x8c8   :  { %1696 = vmax.xlane.f32.xlu1 %v1695_v38  ;;  %v3564_v44 = vpop.f32.mrf.mxu0  ;;  %v3571_v50 = vpop.f32.mrf.mxu1 }
 0x8ca   :  { %v1538_v51 = vpop.f32.mrf.mxu0  ;;  %v1688_v54 = vpop.f32.mrf.mxu1 }
 0x8cb   :  { %v1698_v46 = vsel %vm722_vm3, %v1538_v51, -inf  ;;  %v1713_v21 = vsel %vm722_vm3, %v1688_v54, -inf }
 0x8cc   :  { %1699 = vmax.xlane.f32.xlu0 %v1698_v46  ;;  %v3565_v42 = vpop.f32.mrf.mxu0  ;;  %1705 = vmax.xlane.f32.xlu1 %v1704_v49  ;;  %v3582_v56 = vpop.f32.mrf.mxu1 }
 0x8ce   :  { %v1637_v35 = vpop.f32.mrf.mxu0  ;;  %v1691_v53 = vpop.f32.mrf.mxu1 }
 0x8cf   :  { %v1707_v15 = vsel %vm722_vm3, %v1637_v35, -inf  ;;  %v1716_v19 = vsel %vm722_vm3, %v1691_v53, -inf }
 0x8d0   :  { %1702 = vmax.xlane.f32.xlu0 %v1701_v57  ;;  %v3576_v59 = vpop.f32.mrf.mxu0  ;;  %v3583_v62 = vpop.f32.mrf.mxu1 }
 0x8d2   :  { %v1640_v45 = vpop.f32.mrf.mxu0 }
 0x8d3   :  { %v1710_v16 = vsel %vm722_vm3, %v1640_v45, -inf }
 0x8d4   :  { %1708 = vmax.xlane.f32.xlu0 %v1707_v15  ;;  %1711 = vmax.xlane.f32.xlu1 %v1710_v16  ;;  %v3577_v33 = vpop.f32.mrf.mxu0 }
 0x8d8   :  { %1714 = vmax.xlane.f32.xlu0 %v1713_v21  ;;  %1717 = vmax.xlane.f32.xlu1 %v1716_v19 }
 0x8e9   :  { %1834 = vrot.lane.b32.xlu1 %v4226_v1, %s4010_s24 }
 0x8ed   :  { %1881 = vrot.lane.b32.xlu1 %v4240_v25, %s4010_s24 }
 0x8ee   :  { %1787 = vrot.lane.b32.xlu0 %v4230_v6, %s4010_s24 }
 0x8f1   :  { %1977 = vrot.lane.b32.xlu1 %v4230_v6, %s4011_s25 }
 0x8f2   :  { %1928 = vrot.lane.b32.xlu0 %v4236_v18, %s4010_s24 }
 0x951   :  { %v1697_v36 = vpop.xlane.xlu1 %1696 }
 0x952   :  { %v1719_v50 = vsub.f32 %v1535_v28, %v1697_v36 }
 0x954   :  { %v1727_v57 = vmul.f32 1.442695, %v1719_v50 }
 0x955   :  { %v1706_v31 = vpop.xlane.xlu1 %1705  ;;  %v1700_v14 = vpop.xlane.xlu0 %1699 }
 0x956   :  { %v1722_v38 = vsub.f32 %v1589_v20, %v1706_v31  ;;  %v1720_v44 = vsub.f32 %v1538_v51, %v1700_v14 }
 0x958   :  { %v1733_v46 = vmul.f32 1.442695, %v1722_v38  ;;  %v1729_v49 = vmul.f32 1.442695, %v1720_v44 }
 0x959   :  { %v1703_v42 = vpop.xlane.xlu0 %1702 }
 0x95a   :  { %3904 = vpow2.f32 %v1733_v46  ;;  %v1721_v56 = vsub.f32 %v1586_v37, %v1703_v42 }
 0x95b   :  { %3906 = vpow2.f32 %v1729_v49 }
 0x95c   :  { %v1731_v59 = vmul.f32 1.442695, %v1721_v56 }
 0x95d   :  { %v1712_v62 = vpop.xlane.xlu1 %1711  ;;  %v1709_v15 = vpop.xlane.xlu0 %1708 }
 0x95e   :  { %3908 = vpow2.f32 %v1731_v59  ;;  %v1724_v16 = vsub.f32 %v1640_v45, %v1712_v62  ;;  %v1723_v33 = vsub.f32 %v1637_v35, %v1709_v15 }
 0x95f   :  { %3910 = vpow2.f32 %v1727_v57 }
 0x960   :  { %v1737_v51 = vmul.f32 1.442695, %v1724_v16  ;;  %v1735_v31 = vmul.f32 1.442695, %v1723_v33 }
 0x961   :  { %v1718_v21 = vpop.xlane.xlu1 %1717  ;;  %v1715_v19 = vpop.xlane.xlu0 %1714 }
 0x962   :  { %v1726_v34 = vsub.f32 %v1691_v53, %v1718_v21  ;;  %v1725_v20 = vsub.f32 %v1688_v54, %v1715_v19 }
 0x964   :  { %v1741_v28 = vmul.f32 1.442695, %v1726_v34  ;;  %v1739_v36 = vmul.f32 1.442695, %v1725_v20 }
 0x965   :  { %v1835_v14 = vpop.permute.xlu1 %1834  ;;  %v1788_v38 = vpop.permute.xlu0 %1787 }
 0x966   :  { %3912 = vpow2.f32 %v1741_v28  ;;  %3585 = vmatpush3.bf16.msra.mxu0 %v1788_v38  ;;  %3591 = vmatpush3.bf16.msra.mxu1 %v1835_v14 }
 0x967   :  { %v3905_v37 = vpop.eup %3904  ;;  %3914 = vpow2.f32 %v1739_v36  ;;  %3602 = vmatprep.subr.bf16.mxu1 %v4001_v55  ;;  %3596 = vmatprep.subr.bf16.mxu0 %v4001_v55 }
 0x968   :  { %3916 = vpow2.f32 %v1737_v51  ;;  %v1752_v35 = vsel %vm722_vm3, %v3905_v37, 0.0  ;;  %v3907_v53 = vpop.eup %3906 }
 0x969   :  { %3918 = vpow2.f32 %v1735_v31  ;;  %1753 = vadd.xlane.f32.xlu1 %v1752_v35  ;;  %v1746_v54 = vsel %vm722_vm3, %v3907_v53, 0.0  ;;  %v1882_v16 = vpop.permute.xlu1 %1881  ;;  %v1929_v21 = vpop.permute.xlu0 %1928 }
 0x96b   :  { %v3909_v34 = vpop.eup %3908 }
 0x96c   :  { %v1749_v45 = vsel %vm722_vm3, %v3909_v34, 0.0  ;;  %v3911_v44 = vpop.eup %3910 }
 0x96d   :  { %1747 = vadd.xlane.f32.xlu1 %v1746_v54  ;;  %1750 = vadd.xlane.f32.xlu0 %v1749_v45  ;;  %v1743_v50 = vsel %vm722_vm3, %v3911_v44, 0.0  ;;  %v1978_v33 = vpop.permute.xlu1 %1977 }
 0x971   :  { %1744 = vadd.xlane.f32.xlu0 %v1743_v50 }
 0x973   :  { %v3913_v46 = vpop.eup %3912 }
 0x974   :  { %v3915_v49 = vpop.eup %3914  ;;  %v1764_v42 = vsel %vm722_vm3, %v3913_v46, 0.0 }
 0x975   :  { %v4483_v56 = vpop.eup %3916  ;;  %1765 = vadd.xlane.f32.xlu1 %v1764_v42  ;;  %v1761_v57 = vsel %vm722_vm3, %v3915_v49, 0.0 }
 0x976   :  { %v4486_v59 = vpop.eup %3918  ;;  %1762 = vadd.xlane.f32.xlu0 %v1761_v57  ;;  %v1758_v62 = vsel %vm722_vm3, %v4483_v56, 0.0 }
 0x977   :  { %v1755_v15 = vsel %vm722_vm3, %v4486_v59, 0.0 }
 0x979   :  { %1759 = vadd.xlane.f32.xlu1 %v1758_v62 }
 0x97a   :  { %1756 = vadd.xlane.f32.xlu0 %v1755_v15 }
 0x98a   :  { %1975 = vrot.lane.b32.xlu1 %v4233_v8, %s4012_s26 }
 0x98e   :  { %2026 = vrot.lane.b32.xlu1 %v4228_v4, %s4012_s26 }
 0x990   :  { %2028 = vrot.lane.b32.xlu0 %v4226_v1, %s4011_s25 }
 0x992   :  { %2077 = vrot.lane.b32.xlu1 %v4243_v26, %s4012_s26 }
 0x994   :  { %2079 = vrot.lane.b32.xlu0 %v4240_v25, %s4011_s25 }
 0x998   :  { %2130 = vrot.lane.b32.xlu0 %v4236_v18, %s4011_s25 }
 0x99c   :  { %2128 = vrot.lane.b32.xlu0 %v4238_v23, %s4012_s26 }
 0x9f2   :  { %v1754_v19 = vpop.xlane.xlu1 %1753 }
 0x9f3   :  { %3920 = vrcp.f32 %v1754_v19 }
 0x9f6   :  { %v1748_v8 = vpop.xlane.xlu1 %1747  ;;  %v1751_v4 = vpop.xlane.xlu0 %1750 }
 0x9f7   :  { %3922 = vrcp.f32 %v1751_v4 }
 0x9f8   :  { %3924 = vrcp.f32 %v1748_v8 }
 0x9fa   :  { %v1745_v20 = vpop.xlane.xlu0 %1744 }
 0x9fb   :  { %3926 = vrcp.f32 %v1745_v20 }
 0x9fe   :  { %v1766_v26 = vpop.xlane.xlu1 %1765 }
 0x9ff   :  { %3928 = vrcp.f32 %v1766_v26  ;;  %v1763_v51 = vpop.xlane.xlu0 %1762 }
 0xa00   :  { %3930 = vrcp.f32 %v1763_v51  ;;  %v3921_v36 = vpop.eup %3920 }
 0xa01   :  { %v1778_v35 = vmul.f32 %v3921_v36, %v3905_v37 }
 0xa02   :  { %v1760_v28 = vpop.xlane.xlu1 %1759 }
 0xa03   :  { %3932 = vrcp.f32 %v1760_v28  ;;  %v1757_v31 = vpop.xlane.xlu0 %1756 }
 0xa04   :  { %3934 = vrcp.f32 %v1757_v31  ;;  %v3923_v23 = vpop.eup %3922 }
 0xa05   :  { %v3925_v14 = vpop.eup %3924  ;;  %v1777_v38 = vmul.f32 %v3923_v23, %v3909_v34 }
 0xa06   :  { %v1776_v42 = vmul.f32 %v3925_v14, %v3907_v53 }
 0xa07   :  { %v1784_v45 = vpack.c.bf16 %v1778_v35, %v1777_v38  ;;  %v2029_v57 = vpop.permute.xlu0 %2028 }
 0xa08   :  { %v3927_v54 = vpop.eup %3926  ;;  %v2034_v20 = vsel %vm524_vm2, %v2029_v57, 0 }
 0xa09   :  { %v1775_v50 = vmul.f32 %v3927_v54, %v3911_v44  ;;  %3593 = vmatmul.mubr.msk.bf16.vlgmr.msra.gmra.mxu1 %vm722_vm3, %v1784_v45 }
 0xa0a   :  { %3603 = vmatpush3.bf16.msra.mxu1 %v1929_v21  ;;  %3604 = vmatprep.mubr.msk.bf16.mxu1 %vm4002_vm1, %v4001_v55 }
 0xa0b   :  { %v1783_v62 = vpack.c.bf16 %v1776_v42, %v1775_v50  ;;  %3614 = vmatprep.subr.bf16.mxu1 %v4001_v55  ;;  %v2080_v8 = vpop.permute.xlu0 %2079 }
 0xa0c   :  { %v3929_v15 = vpop.eup %3928 }
 0xa0d   :  { %v3931_v19 = vpop.eup %3930  ;;  %3587 = vmatmul.mubr.msk.bf16.vlgmr.msra.gmra.mxu0 %vm722_vm3, %v1783_v62  ;;  %v1782_v34 = vmul.f32 %v3929_v15, %v3913_v46  ;;  %v1976_v46 = vpop.permute.xlu1 %1975 }
 0xa0e   :  { %3597 = vmatpush3.bf16.msra.mxu0 %v1882_v16  ;;  %v1781_v37 = vmul.f32 %v3931_v19, %v3915_v49  ;;  %3598 = vmatprep.mubr.msk.bf16.mxu0 %vm4002_vm1, %v4001_v55  ;;  %v1983_v16 = vsel %vm524_vm2, %v1978_v33, 0  ;;  %v2085_v33 = vsel %vm524_vm2, %v2080_v8, 0 }
 0xa0f   :  { %3608 = vmatprep.subr.bf16.mxu0 %v4001_v55  ;;  %v2131_v51 = vpop.permute.xlu0 %2130 }
 0xa10   :  { %v3933_v53 = vpop.eup %3932  ;;  %v1786_v44 = vpack.c.bf16 %v1782_v34, %v1781_v37 }
 0xa11   :  { %v3935_v21 = vpop.eup %3934  ;;  %v1780_v4 = vmul.f32 %v3933_v53, %v4483_v56  ;;  %v2027_v56 = vpop.permute.xlu1 %2026 }
 0xa12   :  { %3605 = vmatmul.mubr.msk.bf16.vlgmr.msra.gmra.mxu1 %vm722_vm3, %v1786_v44  ;;  %v1779_v26 = vmul.f32 %v3935_v21, %v4486_v59  ;;  %v2136_v59 = vsel %vm524_vm2, %v2131_v51, 0 }
 0xa13   :  { %3615 = vmatpush3.bf16.xpose.msra.mxu1 %v2034_v20  ;;  %3616 = vmatprep.mubr.msk.bf16.mxu1 %vm4002_vm1, %v4001_v55  ;;  %v2129_v28 = vpop.permute.xlu0 %2128 }
 0xa14   :  { %v1785_v49 = vpack.c.bf16 %v1780_v4, %v1779_v26  ;;  %3626 = vmatprep.subr.bf16.mxu1 %v4001_v55 }
 0xa15   :  { %v2078_v36 = vpop.permute.xlu1 %2077 }
 0xa16   :  { %3599 = vmatmul.mubr.msk.bf16.vlgmr.msra.gmra.mxu0 %vm722_vm3, %v1785_v49 }
 0xa17   :  { %3609 = vmatpush3.bf16.xpose.msra.mxu0 %v1983_v16  ;;  %3610 = vmatprep.mubr.msk.bf16.mxu0 %vm4002_vm1, %v4001_v55 }
 0xa18   :  { %3620 = vmatprep.subr.bf16.mxu0 %v4001_v55 }
 0xa1a   :  { %3617 = vmatmul.mubr.msk.bf16.vlgmr.msra.gmra.mxu1 %vm524_vm2, %v2027_v56 }
 0xa1b   :  { %3627 = vmatpush3.bf16.xpose.msra.mxu1 %v2136_v59  ;;  %3628 = vmatprep.mubr.msk.bf16.mxu1 %vm4002_vm1, %v4001_v55 }
 0xa1c   :  { %3638 = vmatprep.subr.bf16.mxu1 %v4001_v55 }
 0xa1e   :  { %3611 = vmatmul.mubr.msk.bf16.vlgmr.msra.gmra.mxu0 %vm524_vm2, %v1976_v46 }
 0xa1f   :  { %3621 = vmatpush3.bf16.xpose.msra.mxu0 %v2085_v33  ;;  %3622 = vmatprep.mubr.msk.bf16.mxu0 %vm4002_vm1, %v4001_v55 }
 0xa20   :  { %3632 = vmatprep.subr.bf16.mxu0 %v4001_v55 }
 0xa22   :  { %3629 = vmatmul.mubr.msk.bf16.vlgmr.msra.gmra.mxu1 %vm524_vm2, %v2129_v28 }
 0xa23   :  { %3640 = vmatprep.mubr.msk.bf16.mxu1 %vm4002_vm1, %v4001_v55 }
 0xa26   :  { %3623 = vmatmul.mubr.msk.bf16.vlgmr.msra.gmra.mxu0 %vm524_vm2, %v2078_v36 }
 0xa27   :  { %3634 = vmatprep.mubr.msk.bf16.mxu0 %vm4002_vm1, %v4001_v55 }
 0xac9   :  { %v4538_v31 = vpop.f32.mrf.mxu1 }
 0xacb   :  { %v3594_v23 = vpop.f32.mrf.mxu1 }
 0xacd   :  { %v4540_v14 = vpop.f32.mrf.mxu0  ;;  %v4542_v38 = vpop.f32.mrf.mxu1 }
 0xace   :  { %v4928_v3 = vpack.i.bf16 %v4542_v38, %v4538_v31 }
 0xacf   :  { %v3588_v54 = vpop.f32.mrf.mxu0  ;;  %v3595_v45 = vpop.f32.mrf.mxu1 }
 0xad1   :  { %v4546_v50 = vpop.f32.mrf.mxu0 }
 0xad2   :  { %v4550_v57 = vpop.f32.mrf.mxu1 }
 0xad3   :  { %v3589_v62 = vpop.f32.mrf.mxu0 }
 0xad4   :  { %v3606_v15 = vpop.f32.mrf.mxu1 }
 0xad6   :  { %v4552_v19 = vpop.f32.mrf.mxu0  ;;  %v4554_v34 = vpop.f32.mrf.mxu1 }
 0xad8   :  { %v3600_v53 = vpop.f32.mrf.mxu0  ;;  %v3607_v44 = vpop.f32.mrf.mxu1 }
 0xada   :  { %v4558_v21 = vpop.f32.mrf.mxu0  ;;  %v2070_v8 = vpop.f32.mrf.mxu1 }
 0xadb   :  { %v2185_v15 = vsel %vm722_vm3, %v2070_v8, -inf }
 0xadc   :  { %v3601_v20 = vpop.f32.mrf.mxu0  ;;  %v3618_v26 = vpop.f32.mrf.mxu1 }
 0xade   :  { %v2019_v46 = vpop.f32.mrf.mxu0  ;;  %v2073_v49 = vpop.f32.mrf.mxu1 }
 0xadf   :  { %v2179_v16 = vsel %vm722_vm3, %v2019_v46, -inf  ;;  %v2188_v36 = vsel %vm722_vm3, %v2073_v49, -inf }
 0xae0   :  { %2180 = vmax.xlane.f32.xlu1 %v2179_v16  ;;  %v3612_v51 = vpop.f32.mrf.mxu0  ;;  %v3619_v56 = vpop.f32.mrf.mxu1 }
 0xae2   :  { %v2022_v59 = vpop.f32.mrf.mxu0  ;;  %v2172_v33 = vpop.f32.mrf.mxu1 }
 0xae3   :  { %v2182_v28 = vsel %vm722_vm3, %v2022_v59, -inf  ;;  %v2197_v56 = vsel %vm722_vm3, %v2172_v33, -inf }
 0xae4   :  { %2183 = vmax.xlane.f32.xlu0 %v2182_v28  ;;  %v3613_v23 = vpop.f32.mrf.mxu0  ;;  %2189 = vmax.xlane.f32.xlu1 %v2188_v36  ;;  %v3630_v54 = vpop.f32.mrf.mxu1 }
 0xae6   :  { %v2121_v45 = vpop.f32.mrf.mxu0  ;;  %v2175_v62 = vpop.f32.mrf.mxu1 }
 0xae7   :  { %v2191_v26 = vsel %vm722_vm3, %v2121_v45, -inf  ;;  %v2200_v28 = vsel %vm722_vm3, %v2175_v62, -inf }
 0xae8   :  { %2186 = vmax.xlane.f32.xlu0 %v2185_v15  ;;  %v3624_v53 = vpop.f32.mrf.mxu0  ;;  %v3631_v44 = vpop.f32.mrf.mxu1 }
 0xaea   :  { %v2124_v20 = vpop.f32.mrf.mxu0 }
 0xaeb   :  { %v2194_v16 = vsel %vm722_vm3, %v2124_v20, -inf }
 0xaec   :  { %2192 = vmax.xlane.f32.xlu0 %v2191_v26  ;;  %2195 = vmax.xlane.f32.xlu1 %v2194_v16  ;;  %v3625_v51 = vpop.f32.mrf.mxu0 }
 0xaf0   :  { %2198 = vmax.xlane.f32.xlu0 %v2197_v56  ;;  %2201 = vmax.xlane.f32.xlu1 %v2200_v28 }
 0xb01   :  { %2318 = vrot.lane.b32.xlu1 %v4226_v1, %s4013_s27 }
 0xb06   :  { %2271 = vrot.lane.b32.xlu0 %v4230_v6, %s4013_s27 }
 0xb69   :  { %v2181_v36 = vpop.xlane.xlu1 %2180 }
 0xb6a   :  { %v2203_v44 = vsub.f32 %v2019_v46, %v2181_v36 }
 0xb6c   :  { %v2211_v56 = vmul.f32 1.442695, %v2203_v44 }
 0xb6d   :  { %v2190_v23 = vpop.xlane.xlu1 %2189  ;;  %v2184_v54 = vpop.xlane.xlu0 %2183 }
 0xb6e   :  { %v2206_v15 = vsub.f32 %v2073_v49, %v2190_v23  ;;  %v2204_v53 = vsub.f32 %v2022_v59, %v2184_v54 }
 0xb70   :  { %v2217_v26 = vmul.f32 1.442695, %v2206_v15  ;;  %v2213_v16 = vmul.f32 1.442695, %v2204_v53 }
 0xb71   :  { %v2187_v51 = vpop.xlane.xlu0 %2186 }
 0xb72   :  { %3936 = vpow2.f32 %v2217_v26  ;;  %v2205_v4 = vsub.f32 %v2070_v8, %v2187_v51 }
 0xb73   :  { %3938 = vpow2.f32 %v2213_v16 }
 0xb74   :  { %v2215_v28 = vmul.f32 1.442695, %v2205_v4 }
 0xb75   :  { %v2196_v37 = vpop.xlane.xlu1 %2195  ;;  %v2193_v35 = vpop.xlane.xlu0 %2192 }
 0xb76   :  { %3940 = vpow2.f32 %v2215_v28  ;;  %v2208_v1 = vsub.f32 %v2124_v20, %v2196_v37  ;;  %v2207_v6 = vsub.f32 %v2121_v45, %v2193_v35  ;;  %v4926_v28 = vpack.i.bf16 %v4442_v9, %v4438_v63 }
 0xb77   :  { %3942 = vpow2.f32 %v2211_v56  ;;  %v4925_v56 = vpack.i.bf16 %v4546_v50, %v4540_v14 }
 0xb78   :  { %v2221_v59 = vmul.f32 1.442695, %v2208_v1  ;;  %v2219_v23 = vmul.f32 1.442695, %v2207_v6 }
 0xb79   :  { %v2202_v41 = vpop.xlane.xlu1 %2201  ;;  %v2199_v10 = vpop.xlane.xlu0 %2198 }
 0xb7a   :  { %v2210_v42 = vsub.f32 %v2175_v62, %v2202_v41  ;;  %v2209_v49 = vsub.f32 %v2172_v33, %v2199_v10 }
 0xb7c   :  { %v2225_v46 = vmul.f32 1.442695, %v2210_v42  ;;  %v2223_v36 = vmul.f32 1.442695, %v2209_v49 }
 0xb7d   :  { %v2319_v54 = vpop.permute.xlu1 %2318  ;;  %v2272_v15 = vpop.permute.xlu0 %2271 }
 0xb7e   :  { %3944 = vpow2.f32 %v2225_v46  ;;  %3633 = vmatpush3.bf16.msra.mxu0 %v2272_v15  ;;  %3639 = vmatpush3.bf16.msra.mxu1 %v2319_v54 }
 0xb7f   :  { %v3937_v8 = vpop.eup %3936  ;;  %3946 = vpow2.f32 %v2223_v36  ;;  %3650 = vmatprep.subr.bf16.mxu1 %v4001_v55  ;;  %3644 = vmatprep.subr.bf16.mxu0 %v4001_v55 }
 0xb80   :  { %3948 = vpow2.f32 %v2221_v59  ;;  %v2236_v35 = vsel %vm722_vm3, %v3937_v8, 0.0  ;;  %v3939_v41 = vpop.eup %3938 }
 0xb81   :  { %3950 = vpow2.f32 %v2219_v23  ;;  %2237 = vadd.xlane.f32.xlu1 %v2236_v35  ;;  %v2230_v42 = vsel %vm722_vm3, %v3939_v41, 0.0 }
 0xb83   :  { %v3941_v10 = vpop.eup %3940 }
 0xb84   :  { %v2233_v37 = vsel %vm722_vm3, %v3941_v10, 0.0  ;;  %v3943_v4 = vpop.eup %3942 }
 0xb85   :  { %2231 = vadd.xlane.f32.xlu1 %v2230_v42  ;;  %2234 = vadd.xlane.f32.xlu0 %v2233_v37  ;;  %v2227_v33 = vsel %vm722_vm3, %v3943_v4, 0.0 }
 0xb89   :  { %2228 = vadd.xlane.f32.xlu0 %v2227_v33 }
 0xb8b   :  { %v3945_v45 = vpop.eup %3944 }
 0xb8c   :  { %v3947_v62 = vpop.eup %3946  ;;  %v2248_v20 = vsel %vm722_vm3, %v3945_v45, 0.0 }
 0xb8d   :  { %v3949_v53 = vpop.eup %3948  ;;  %2249 = vadd.xlane.f32.xlu1 %v2248_v20  ;;  %v2245_v44 = vsel %vm722_vm3, %v3947_v62, 0.0 }
 0xb8e   :  { %v3951_v26 = vpop.eup %3950  ;;  %2246 = vadd.xlane.f32.xlu0 %v2245_v44  ;;  %v2242_v16 = vsel %vm722_vm3, %v3949_v53, 0.0  ;;  %v3816_v44 = vld [vmem:[%s4921_s3 + $0x8] sm:$0xff]  }
 0xb8f   :  { %v2239_v51 = vsel %vm722_vm3, %v3951_v26, 0.0 }
 0xb91   :  { %2243 = vadd.xlane.f32.xlu1 %v2242_v16 }
 0xb92   :  { %2240 = vadd.xlane.f32.xlu0 %v2239_v51 }
 0xba2   :  { %2365 = vrot.lane.b32.xlu1 %v4240_v25, %s4013_s27  ;;  %v4927_v25 = vpack.i.bf16 %v4458_v40, %v4452_v30 }
 0xba6   :  { %3753 = vrot.lane.b32.xlu1 %v3752_v24, %s4014_s28 }
 0xba8   :  { %2412 = vrot.lane.b32.xlu0 %v4236_v18, %s4013_s27  ;;  %v4929_v18 = vpack.i.bf16 %v4454_v17, %v4450_v27 }
 0xbaa   :  { %3763 = vrot.lane.b32.xlu1 %v4925_v56, %s4015_s29 }
 0xbac   :  { %3758 = vrot.lane.b32.xlu0 %v4926_v28, %s4014_s28 }
 0xbae   :  { %3773 = vrot.lane.b32.xlu1 %v4927_v25, %s4014_s28 }
 0xbb0   :  { %3768 = vrot.lane.b32.xlu0 %v4928_v3, %s4015_s29 }
 0xbb4   :  { %3778 = vrot.lane.b32.xlu0 %v4929_v18, %s4014_s28 }
 0xc0a   :  { %v2238_v22 = vpop.xlane.xlu1 %2237 }
 0xc0b   :  { %3952 = vrcp.f32 %v2238_v22 }
 0xc0e   :  { %v2232_v24 = vpop.xlane.xlu1 %2231  ;;  %v2235_v14 = vpop.xlane.xlu0 %2234 }
 0xc0f   :  { %3954 = vrcp.f32 %v2235_v14 }
 0xc10   :  { %3956 = vrcp.f32 %v2232_v24  ;;  %v4930_v24 = vpack.i.bf16 %v4554_v34, %v4550_v57 }
 0xc12   :  { %v2229_v63 = vpop.xlane.xlu0 %2228 }
 0xc13   :  { %3958 = vrcp.f32 %v2229_v63 }
 0xc16   :  { %v2250_v9 = vpop.xlane.xlu1 %2249 }
 0xc17   :  { %3960 = vrcp.f32 %v2250_v9  ;;  %v2247_v30 = vpop.xlane.xlu0 %2246 }
 0xc18   :  { %3962 = vrcp.f32 %v2247_v30  ;;  %v3953_v50 = vpop.eup %3952 }
 0xc19   :  { %v2262_v1 = vmul.f32 %v3953_v50, %v3937_v8  ;;  %v4931_v50 = vpack.i.bf16 %v4558_v21, %v4552_v19 }
 0xc1a   :  { %v2244_v40 = vpop.xlane.xlu1 %2243 }
 0xc1b   :  { %3964 = vrcp.f32 %v2244_v40  ;;  %v2241_v31 = vpop.xlane.xlu0 %2240 }
 0xc1c   :  { %3966 = vrcp.f32 %v2241_v31  ;;  %v3955_v38 = vpop.eup %3954 }
 0xc1d   :  { %v3957_v27 = vpop.eup %3956  ;;  %v2261_v17 = vmul.f32 %v3955_v38, %v3941_v10 }
 0xc1e   :  { %v2260_v46 = vmul.f32 %v3957_v27, %v3939_v41  ;;  %v2366_v35 = vpop.permute.xlu1 %2365 }
 0xc1f   :  { %v2268_v49 = vpack.c.bf16 %v2262_v1, %v2261_v17  ;;  %v2413_v36 = vpop.permute.xlu0 %2412 }
 0xc20   :  { %v3959_v6 = vpop.eup %3958 }
 0xc21   :  { %v2259_v59 = vmul.f32 %v3959_v6, %v3943_v4  ;;  %3641 = vmatmul.mubr.msk.bf16.vlgmr.msra.gmra.mxu1 %vm722_vm3, %v2268_v49 }
 0xc22   :  { %3651 = vmatpush3.bf16.msra.mxu1 %v2413_v36  ;;  %3652 = vmatprep.mubr.msk.bf16.mxu1 %vm4002_vm1, %v4001_v55  ;;  %v3754_v1 = vpop.permute.xlu1 %3753 }
 0xc23   :  { %v2267_v23 = vpack.c.bf16 %v2260_v46, %v2259_v59  ;;  %v3759_v17 = vpop.permute.xlu0 %3758  ;;  %v3756_v49 = vunpack.i.h.bf16 %v3754_v1  ;;  %v3755_v59 = vunpack.i.l.bf16 %v3754_v1 }
 0xc24   :  { %v3961_v54 = vpop.eup %3960  ;;  %v3761_v46 = vunpack.i.h.bf16 %v3759_v17  ;;  %v3760_v36 = vunpack.i.l.bf16 %v3759_v17 }
 0xc25   :  { %v3963_v15 = vpop.eup %3962  ;;  %3635 = vmatmul.mubr.msk.bf16.vlgmr.msra.gmra.mxu0 %vm722_vm3, %v2267_v23  ;;  %v2266_v42 = vmul.f32 %v3961_v54, %v3945_v45 }
 0xc26   :  { %3645 = vmatpush3.bf16.msra.mxu0 %v2366_v35  ;;  %v2265_v8 = vmul.f32 %v3963_v15, %v3947_v62  ;;  %3646 = vmatprep.mubr.msk.bf16.mxu0 %vm4002_vm1, %v4001_v55  ;;  %v3817_v55 = vld [vmem:[%s4921_s3] sm:$0xff]   ;;  %v3764_v57 = vpop.permute.xlu1 %3763 }
 0xc27   :  { %3656 = vmatprep.subr.bf16.mxu0 %v3816_v44  ;;  %v3769_v6 = vpop.permute.xlu0 %3768  ;;  %v3766_v19 = vunpack.i.h.bf16 %v3764_v57  ;;  %v3765_v21 = vunpack.i.l.bf16 %v3764_v57 }
 0xc28   :  { %v3965_v41 = vpop.eup %3964  ;;  %v2270_v10 = vpack.c.bf16 %v2266_v42, %v2265_v8  ;;  %v3771_v54 = vunpack.i.h.bf16 %v3769_v6  ;;  %v3770_v15 = vunpack.i.l.bf16 %v3769_v6 }
 0xc29   :  { %v3967_v37 = vpop.eup %3966  ;;  %v2264_v4 = vmul.f32 %v3965_v41, %v3949_v53  ;;  %v2556_v41 = vsel %vm524_vm2, %v4352_v0, %v3756_v49 }
 0xc2a   :  { %3653 = vmatmul.mubr.msk.bf16.vlgmr.msra.gmra.mxu1 %vm722_vm3, %v2270_v10  ;;  %v2263_v33 = vmul.f32 %v3967_v37, %v3951_v26  ;;  %v3774_v23 = vpop.permute.xlu1 %3773  ;;  %v2555_v10 = vsel %vm524_vm2, %v4348_v60, %v3755_v59  ;;  %v2558_v37 = vsel %vm524_vm2, %v4350_v61, %v3761_v46  ;;  %v2564_v0 = vsel %vm722_vm3, %v2556_v41, %v3766_v19 }
 0xc2b   :  { %v3779_v34 = vpop.permute.xlu0 %3778 }
 0xc2c   :  { %v2269_v20 = vpack.c.bf16 %v2264_v4, %v2263_v33  ;;  %v2557_v4 = vsel %vm524_vm2, %v4346_v58, %v3760_v36 }
 0xc2e   :  { %3647 = vmatmul.mubr.msk.bf16.vlgmr.msra.gmra.mxu0 %vm722_vm3, %v2269_v20  ;;  %v2565_v20 = vsel %vm722_vm3, %v2557_v4, %v3770_v15  ;;  %v4670_v15 = vld [vmem:[%s4919_s6] sm:$0xff] }
 0xc2f   :  { %3657 = vmatpush3.bf16.msra.mxu0 %v3816_v44  ;;  %v2566_v44 = vsel %vm722_vm3, %v2558_v37, %v3771_v54 }
 0xc30   :  { %3658 = vmatprep.subr.bf16.mxu0 %v3817_v55 }
 0xc33   :  { %3659 = vmatpush3.bf16.msra.mxu0 %v3817_v55 }
 0xce1   :  { %v2358_v45 = vpop.f32.mrf.mxu1 }
 0xce3   :  { %v3642_v62 = vpop.f32.mrf.mxu1 }
 0xce5   :  { %v2311_v53 = vpop.f32.mrf.mxu0  ;;  %v2361_v16 = vpop.f32.mrf.mxu1 }
 0xce6   :  { %v3782_v26 = vpack.i.bf16 %v2361_v16, %v2358_v45 }
 0xce7   :  { %v3636_v51 = vpop.f32.mrf.mxu0  ;;  %v3643_v56 = vpop.f32.mrf.mxu1 }
 0xce8   :  { %3783 = vrot.lane.b32.xlu0 %v3782_v26, %s4016_s11  ;;  %v3776_v26 = vunpack.i.h.bf16 %v3774_v23 }
 0xce9   :  { %v2314_v28 = vpop.f32.mrf.mxu0 }
 0xcea   :  { %v3787_v25 = vpack.i.bf16 %v2314_v28, %v2311_v53  ;;  %v2452_v3 = vpop.f32.mrf.mxu1  ;;  %v2563_v53 = vsel %vm722_vm3, %v2555_v10, %v3765_v21  ;;  %v3775_v28 = vunpack.i.l.bf16 %v3774_v23  ;;  %v2590_v23 = vsub.s32 3, %v4115_v43 }
 0xceb   :  { %v3637_v18 = vpop.f32.mrf.mxu0 }
 0xcec   :  { %v3654_v22 = vpop.f32.mrf.mxu1  ;;  %3788 = vrot.lane.b32.xlu1 %v3787_v25, %s4016_s11  ;;  %3798 = vrot.lane.b32.xlu0 %v4930_v24, %s4015_s29  ;;  %v3781_v25 = vunpack.i.h.bf16 %v3779_v34 }
 0xcee   :  { %v2405_v14 = vpop.f32.mrf.mxu0  ;;  %v2455_v63 = vpop.f32.mrf.mxu1 }
 0xcef   :  { %v3807_v9 = vpack.i.bf16 %v2455_v63, %v2452_v3  ;;  %v3780_v3 = vunpack.i.l.bf16 %v3779_v34 }
 0xcf0   :  { %v3648_v30 = vpop.f32.mrf.mxu0  ;;  %v3655_v40 = vpop.f32.mrf.mxu1  ;;  %3793 = vrot.lane.b32.xlu1 %v4931_v50, %s4015_s29  ;;  %v2560_v50 = vsel %vm524_vm2, %v4360_v13, %v3776_v26 }
 0xcf1   :  { %3808 = vrot.lane.b32.xlu0 %v3807_v9, %s4016_s11 }
 0xcf2   :  { %v2408_v31 = vpop.f32.mrf.mxu0 }
 0xcf3   :  { %v3802_v38 = vpack.i.bf16 %v2408_v31, %v2405_v14  ;;  %v2559_v31 = vsel %vm524_vm2, %v4356_v5, %v3775_v28 }
 0xcf4   :  { %v3649_v27 = vpop.f32.mrf.mxu0 }
 0xcf5   :  { %3803 = vrot.lane.b32.xlu1 %v3802_v38, %s4016_s11  ;;  %v2562_v38 = vsel %vm524_vm2, %v4358_v7, %v3781_v25  ;;  %v2561_v27 = vsel %vm524_vm2, %v4354_v2, %v3780_v3 }
 0xd5a   :  { %v3784_v35 = vpop.permute.xlu0 %3783 }
 0xd5b   :  { %v3786_v42 = vunpack.i.h.bf16 %v3784_v35  ;;  %v3785_v8 = vunpack.i.l.bf16 %v3784_v35  ;;  %v2591_v35 = vrot.slane %v4670_v15, %v2590_v23 }
 0xd5d   :  { %v2574_v60 = vsel %vm2571_vm4, %v2565_v20, %v3785_v8  ;;  %v2575_v16 = vsel %vm2571_vm4, %v2566_v44, %v3786_v42 }
 0xd5e   :  { %v3789_v33 = vpop.permute.xlu1 %3788  ;;  %v3799_v62 = vpop.permute.xlu0 %3798  ;;  %v2585_v18 = vpack.c.bf16 %v2575_v16, %v2574_v60 }
 0xd5f   :  { %v3791_v55 = vunpack.i.h.bf16 %v3789_v33  ;;  %v3790_v45 = vunpack.i.l.bf16 %v3789_v33  ;;  %v3801_v24 = vunpack.i.h.bf16 %v3799_v62  ;;  %v3800_v14 = vunpack.i.l.bf16 %v3799_v62 }
 0xd61   :  { %v2573_v61 = vsel %vm2571_vm4, %v2564_v0, %v3791_v55  ;;  %v2572_v58 = vsel %vm2571_vm4, %v2563_v53, %v3790_v45  ;;  %v2569_v1 = vsel %vm722_vm3, %v2561_v27, %v3800_v14  ;;  %v2570_v6 = vsel %vm722_vm3, %v2562_v38, %v3801_v24 }
 0xd62   :  { %v2584_v51 = vpack.c.bf16 %v2573_v61, %v2572_v58  ;;  %v3794_v56 = vpop.permute.xlu1 %3793 }
 0xd63   :  { %v3809_v22 = vpop.permute.xlu0 %3808  ;;  %v3796_v63 = vunpack.i.h.bf16 %v3794_v56  ;;  %v3795_v9 = vunpack.i.l.bf16 %v3794_v56 }
 0xd64   :  { %3660 = vmatprep.mubr.msk.bf16.mxu0 %vm197_vm0, %v2584_v51  ;;  %v3811_v30 = vunpack.i.h.bf16 %v3809_v22  ;;  %v3810_v40 = vunpack.i.l.bf16 %v3809_v22 }
 0xd65   :  { %3661 = vmatmul.mubr.msk.bf16.vlgmr.msra.gmra.mxu0 %vm197_vm0, %v2585_v18  ;;  %v2568_v49 = vsel %vm722_vm3, %v2560_v50, %v3796_v63  ;;  %v2567_v13 = vsel %vm722_vm3, %v2559_v31, %v3795_v9 }
 0xd66   :  { %v2578_v59 = vsel %vm2571_vm4, %v2569_v1, %v3810_v40  ;;  %v2579_v5 = vsel %vm2571_vm4, %v2570_v6, %v3811_v30 }
 0xd67   :  { %v3804_v17 = vpop.permute.xlu1 %3803  ;;  %v2587_v36 = vpack.c.bf16 %v2579_v5, %v2578_v59 }
 0xd68   :  { %v3806_v57 = vunpack.i.h.bf16 %v3804_v17  ;;  %v3805_v34 = vunpack.i.l.bf16 %v3804_v17 }
 0xd6a   :  { %v2577_v7 = vsel %vm2571_vm4, %v2568_v49, %v3806_v57  ;;  %v2576_v46 = vsel %vm2571_vm4, %v2567_v13, %v3805_v34 }
 0xd6b   :  { %v2586_v2 = vpack.c.bf16 %v2577_v7, %v2576_v46 }
 0xd6d   :  { %3664 = vmatprep.mubr.msk.bf16.mxu0 %vm197_vm0, %v2586_v2 }
 0xd6e   :  { %3665 = vmatmul.mubr.msk.bf16.gmra.mxu0 %vm197_vm0, %v2587_v36 }
 0xe25   :  { %v3662_v54 = vpop.f32.mrf.mxu0 }
 0xe26   :  { %v2659_v37 = vadd.f32 %v3662_v54, %v2591_v35 }
 0xe27   :  { %v2650_v19 = vpop.f32.mrf.mxu0 }
 0xe28   :  { %v2651_v21 = vadd.f32 %v2650_v19, %v2591_v35  ;;  %v2683_v45 = vadd.f32 %v2659_v37, %v4194_v11 }
 0xe29   :  { %v3663_v42 = vpop.f32.mrf.mxu0 }
 0xe2a   :  { %v2681_v8 = vadd.f32 %v2651_v21, %v4186_v12  ;;  %v2662_v41 = vadd.f32 %v3663_v42, %v2591_v35  ;;  %v2695_v58 = vsel %vm197_vm0, %v2683_v45, 0.0 }
 0xe2b   :  { %v2653_v10 = vpop.f32.mrf.mxu0 }
 0xe2c   :  { %v2684_v4 = vadd.f32 %v2662_v41, %v4196_v39  ;;  %v2654_v33 = vadd.f32 %v2653_v10, %v2591_v35  ;;  %v2689_v20 = vsel %vm197_vm0, %v2681_v8, 0.0 }
 0xe2d   :  { %2690 = vadd.xlane.f32.xlu1 %v2689_v20  ;;  %v3818_v20 = vld [vmem:[%s4922_s4 + $0x8] sm:$0xff]  }
 0xe2e   :  { %v2682_v44 = vadd.f32 %v2654_v33, %v4188_v32  ;;  %v3666_v55 = vpop.f32.mrf.mxu0  ;;  %v2698_v0 = vsel %vm197_vm0, %v2684_v4, 0.0  ;;  %3668 = vmatprep.subr.bf16.mxu1 %v3818_v20 }
 0xe2f   :  { %v2675_v16 = vadd.f32 %v3666_v55, %v2591_v35  ;;  %3669 = vmatpush3.bf16.msra.mxu1 %v3818_v20 }
 0xe30   :  { %v2666_v62 = vpop.f32.mrf.mxu0  ;;  %v2692_v53 = vsel %vm197_vm0, %v2682_v44, 0.0 }
 0xe31   :  { %v2667_v12 = vadd.f32 %v2666_v62, %v2591_v35  ;;  %2693 = vadd.xlane.f32.xlu0 %v2692_v53  ;;  %2699 = vadd.xlane.f32.xlu1 %v2698_v0  ;;  %v2687_v51 = vadd.f32 %v2675_v16, %v4211_v29 }
 0xe32   :  { %v3667_v60 = vpop.f32.mrf.mxu0 }
 0xe33   :  { %v2685_v39 = vadd.f32 %v2667_v12, %v4203_v47  ;;  %v2678_v26 = vadd.f32 %v3667_v60, %v2591_v35  ;;  %v2707_v47 = vsel %vm197_vm0, %v2687_v51, 0.0 }
 0xe34   :  { %v2669_v61 = vpop.f32.mrf.mxu0 }
 0xe35   :  { %v2670_v32 = vadd.f32 %v2669_v61, %v2591_v35  ;;  %2696 = vadd.xlane.f32.xlu0 %v2695_v58  ;;  %v2701_v56 = vsel %vm197_vm0, %v2685_v39, 0.0  ;;  %v2688_v28 = vadd.f32 %v2678_v26, %v4213_v52 }
 0xe37   :  { %v2686_v11 = vadd.f32 %v2670_v32, %v4205_v48  ;;  %v2710_v3 = vsel %vm197_vm0, %v2688_v28, 0.0 }
 0xe39   :  { %2702 = vadd.xlane.f32.xlu0 %v2701_v56  ;;  %v2704_v25 = vsel %vm197_vm0, %v2686_v11, 0.0 }
 0xe3a   :  { %2705 = vadd.xlane.f32.xlu1 %v2704_v25  ;;  %v2795_v25 = vsub.s32 4, %v4115_v43 }
 0xe3d   :  { %2708 = vadd.xlane.f32.xlu0 %v2707_v47 }
 0xe3e   :  { %2711 = vadd.xlane.f32.xlu1 %v2710_v3 }
 0xeb6   :  { %v2691_v18 = vpop.xlane.xlu1 %2690 }
 0xeb7   :  { %v2713_v22 = vmul.f32 0.03125, %v2691_v18 }
 0xeb9   :  { %v4689_v24 = vsub.f32 %v2681_v8, %v2713_v22 }
 0xeba   :  { %v2694_v48 = vpop.xlane.xlu0 %2693  ;;  %v2700_v29 = vpop.xlane.xlu1 %2699 }
 0xebb   :  { %v2714_v14 = vmul.f32 0.03125, %v2694_v48  ;;  %v2716_v63 = vmul.f32 0.03125, %v2700_v29  ;;  %v2729_v52 = vmul.f32 %v4689_v24, %v4689_v24 }
 0xebd   :  { %v4693_v9 = vsub.f32 %v2682_v44, %v2714_v14  ;;  %v4695_v30 = vsub.f32 %v2684_v4, %v2716_v63  ;;  %v2737_v40 = vsel %vm197_vm0, %v2729_v52, 0.0  ;;  %v3819_v44 = vld [vmem:[%s4922_s4] sm:$0xff]   ;;  %v2796_v52 = vrot.slane %v4670_v15, %v2795_v25 }
 0xebe   :  { %v2697_v50 = vpop.xlane.xlu0 %2696  ;;  %2738 = vadd.xlane.f32.xlu0 %v2737_v40  ;;  %3670 = vmatprep.subr.bf16.mxu1 %v3819_v44  ;;  %v2807_v40 = vsub.s32 5, %v4115_v43 }
 0xebf   :  { %v2715_v31 = vmul.f32 0.03125, %v2697_v50  ;;  %v2730_v38 = vmul.f32 %v4693_v9, %v4693_v9  ;;  %v2732_v1 = vmul.f32 %v4695_v30, %v4695_v30  ;;  %3671 = vmatpush3.bf16.msra.mxu1 %v3819_v44 }
 0xec1   :  { %v4700_v27 = vsub.f32 %v2683_v45, %v2715_v31  ;;  %v2740_v17 = vsel %vm197_vm0, %v2730_v38, 0.0  ;;  %v2746_v7 = vsel %vm197_vm0, %v2732_v1, 0.0  ;;  %v2808_v1 = vrot.slane %v4670_v15, %v2807_v40 }
 0xec2   :  { %v2703_v6 = vpop.xlane.xlu0 %2702  ;;  %2741 = vadd.xlane.f32.xlu1 %v2740_v17 }
 0xec3   :  { %v2717_v57 = vmul.f32 0.03125, %v2703_v6  ;;  %v2706_v34 = vpop.xlane.xlu1 %2705  ;;  %v2731_v49 = vmul.f32 %v4700_v27, %v4700_v27 }
 0xec4   :  { %v2718_v13 = vmul.f32 0.03125, %v2706_v34 }
 0xec5   :  { %v4707_v59 = vsub.f32 %v2685_v39, %v2717_v57  ;;  %v2743_v5 = vsel %vm197_vm0, %v2731_v49, 0.0 }
 0xec6   :  { %v4711_v46 = vsub.f32 %v2686_v11, %v2718_v13  ;;  %v2709_v2 = vpop.xlane.xlu0 %2708  ;;  %2744 = vadd.xlane.f32.xlu0 %v2743_v5  ;;  %2747 = vadd.xlane.f32.xlu1 %v2746_v7 }
 0xec7   :  { %v2719_v36 = vmul.f32 0.03125, %v2709_v2  ;;  %v2712_v23 = vpop.xlane.xlu1 %2711  ;;  %v2733_v54 = vmul.f32 %v4707_v59, %v4707_v59 }
 0xec8   :  { %v2720_v35 = vmul.f32 0.03125, %v2712_v23  ;;  %v2734_v19 = vmul.f32 %v4711_v46, %v4711_v46 }
 0xec9   :  { %v4717_v21 = vsub.f32 %v2687_v51, %v2719_v36  ;;  %v2749_v42 = vsel %vm197_vm0, %v2733_v54, 0.0 }
 0xeca   :  { %v4720_v8 = vsub.f32 %v2688_v28, %v2720_v35  ;;  %2750 = vadd.xlane.f32.xlu0 %v2749_v42  ;;  %v2752_v41 = vsel %vm197_vm0, %v2734_v19, 0.0 }
 0xecb   :  { %2753 = vadd.xlane.f32.xlu1 %v2752_v41  ;;  %v2735_v10 = vmul.f32 %v4717_v21, %v4717_v21 }
 0xecc   :  { %v2736_v37 = vmul.f32 %v4720_v8, %v4720_v8 }
 0xecd   :  { %v2755_v4 = vsel %vm197_vm0, %v2735_v10, 0.0 }
 0xece   :  { %2756 = vadd.xlane.f32.xlu0 %v2755_v4  ;;  %v2758_v33 = vsel %vm197_vm0, %v2736_v37, 0.0 }
 0xecf   :  { %2759 = vadd.xlane.f32.xlu1 %v2758_v33 }
 0xf47   :  { %v2739_v55 = vpop.xlane.xlu0 %2738 }
 0xf48   :  { %v2761_v45 = vmul.f32 0.03125, %v2739_v55 }
 0xf4a   :  { %v2769_v62 = vadd.f32 1e-05, %v2761_v45 }
 0xf4b   :  { %v2742_v53 = vpop.xlane.xlu1 %2741 }
 0xf4c   :  { %3968 = vrsqrt.f32 %v2769_v62  ;;  %v2762_v0 = vmul.f32 0.03125, %v2742_v53  ;;  %v3821_v53 = vld [vmem:[%s4923_s5 + $0x10] sm:$0xff]  }
 0xf4e   :  { %v2770_v12 = vadd.f32 1e-05, %v2762_v0  ;;  %v3822_v0 = vld [vmem:[%s4923_s5 + $0x8] sm:$0xff]  }
 0xf4f   :  { %v2745_v60 = vpop.xlane.xlu0 %2744  ;;  %v2748_v16 = vpop.xlane.xlu1 %2747 }
 0xf50   :  { %3970 = vrsqrt.f32 %v2770_v12  ;;  %v2763_v39 = vmul.f32 0.03125, %v2745_v60  ;;  %v2764_v61 = vmul.f32 0.03125, %v2748_v16  ;;  %v3823_v12 = vld [vmem:[%s4923_s5] sm:$0xff]   ;;  %v3317_v60 = vld [vmem:[%s4919_s6 + $0x8] ss:$0 sm:$0xff] }
 0xf52   :  { %v2771_v58 = vadd.f32 1e-05, %v2763_v39  ;;  %v2772_v26 = vadd.f32 1e-05, %v2764_v61 }
 0xf53   :  { %v2751_v32 = vpop.xlane.xlu0 %2750 }
 0xf54   :  { %3972 = vrsqrt.f32 %v2771_v58  ;;  %v2765_v11 = vmul.f32 0.03125, %v2751_v32  ;;  %v2754_v51 = vpop.xlane.xlu1 %2753 }
 0xf55   :  { %3974 = vrsqrt.f32 %v2772_v26  ;;  %v2766_v56 = vmul.f32 0.03125, %v2754_v51 }
 0xf56   :  { %v2773_v28 = vadd.f32 1e-05, %v2765_v11 }
 0xf57   :  { %v2774_v47 = vadd.f32 1e-05, %v2766_v56  ;;  %v2757_v3 = vpop.xlane.xlu0 %2756 }
 0xf58   :  { %3976 = vrsqrt.f32 %v2773_v28  ;;  %v2767_v18 = vmul.f32 0.03125, %v2757_v3  ;;  %v2760_v22 = vpop.xlane.xlu1 %2759 }
 0xf59   :  { %v3969_v48 = vpop.eup %3968  ;;  %3978 = vrsqrt.f32 %v2774_v47  ;;  %v2768_v29 = vmul.f32 0.03125, %v2760_v22 }
 0xf5a   :  { %v2775_v14 = vadd.f32 1e-05, %v2767_v18  ;;  %v2785_v63 = vmul.f32 %v3969_v48, %v4689_v24 }
 0xf5b   :  { %v2776_v50 = vadd.f32 1e-05, %v2768_v29 }
 0xf5c   :  { %3980 = vrsqrt.f32 %v2775_v14  ;;  %v2797_v17 = vmul.f32 %v2796_v52, %v2785_v63 }
 0xf5d   :  { %v3971_v31 = vpop.eup %3970  ;;  %3982 = vrsqrt.f32 %v2776_v50 }
 0xf5e   :  { %v2786_v38 = vmul.f32 %v3971_v31, %v4693_v9  ;;  %v4742_v13 = vadd.f32 %v2808_v1, %v2797_v17 }
 0xf60   :  { %v2798_v6 = vmul.f32 %v2796_v52, %v2786_v38 }
 0xf61   :  { %v3973_v57 = vpop.eup %3972 }
 0xf62   :  { %v3975_v34 = vpop.eup %3974  ;;  %v2787_v49 = vmul.f32 %v3973_v57, %v4700_v27  ;;  %v4744_v24 = vadd.f32 %v2808_v1, %v2798_v6 }
 0xf63   :  { %v2788_v5 = vmul.f32 %v3975_v34, %v4695_v30 }
 0xf64   :  { %v2821_v7 = vpack.c.bf16 %v4744_v24, %v4742_v13  ;;  %v2799_v2 = vmul.f32 %v2796_v52, %v2787_v49 }
 0xf65   :  { %v3977_v36 = vpop.eup %3976  ;;  %v2800_v9 = vmul.f32 %v2796_v52, %v2788_v5 }
 0xf66   :  { %v3979_v23 = vpop.eup %3978  ;;  %3672 = vmatprep.mubr.msk.bf16.mxu1 %vm197_vm0, %v2821_v7  ;;  %v4750_v54 = vadd.f32 %v2808_v1, %v2799_v2  ;;  %v2789_v35 = vmul.f32 %v3977_v36, %v4707_v59 }
 0xf67   :  { %v4753_v27 = vadd.f32 %v2808_v1, %v2800_v9  ;;  %v2790_v19 = vmul.f32 %v3979_v23, %v4711_v46 }
 0xf68   :  { %v2801_v42 = vmul.f32 %v2796_v52, %v2789_v35 }
 0xf69   :  { %v3981_v41 = vpop.eup %3980  ;;  %v2822_v30 = vpack.c.bf16 %v4753_v27, %v4750_v54  ;;  %v2802_v10 = vmul.f32 %v2796_v52, %v2790_v19 }
 0xf6a   :  { %v3983_v37 = vpop.eup %3982  ;;  %v4758_v4 = vadd.f32 %v2808_v1, %v2801_v42  ;;  %v2791_v33 = vmul.f32 %v3981_v41, %v4717_v21 }
 0xf6b   :  { %3673 = vmatmul.mubr.msk.bf16.vlgmr.msra.gmra.mxu1 %vm197_vm0, %v2822_v30  ;;  %v4762_v20 = vadd.f32 %v2808_v1, %v2802_v10  ;;  %v2792_v59 = vmul.f32 %v3983_v37, %v4720_v8  ;;  %v3820_v8 = vld [vmem:[%s4923_s5 + $0x18] sm:$0xff]  }
 0xf6c   :  { %v2803_v44 = vmul.f32 %v2796_v52, %v2791_v33  ;;  %3680 = vmatprep.subr.bf16.mxu0 %v3820_v8 }
 0xf6d   :  { %v2823_v46 = vpack.c.bf16 %v4762_v20, %v4758_v4  ;;  %v2804_v55 = vmul.f32 %v2796_v52, %v2792_v59  ;;  %3681 = vmatpush3.bf16.msra.mxu0 %v3820_v8 }
 0xf6e   :  { %v4767_v45 = vadd.f32 %v2808_v1, %v2803_v44  ;;  %3682 = vmatprep.subr.bf16.mxu0 %v3821_v53 }
 0xf6f   :  { %3676 = vmatprep.mubr.msk.bf16.mxu1 %vm197_vm0, %v2823_v46  ;;  %v4770_v62 = vadd.f32 %v2808_v1, %v2804_v55 }
 0xf71   :  { %v2824_v21 = vpack.c.bf16 %v4770_v62, %v4767_v45  ;;  %3683 = vmatpush3.bf16.msra.mxu0 %v3821_v53 }
 0xf72   :  { %3684 = vmatprep.subr.bf16.mxu0 %v3822_v0 }
 0xf73   :  { %3677 = vmatmul.mubr.msk.bf16.gmra.mxu1 %vm197_vm0, %v2824_v21 }
 0xf75   :  { %3685 = vmatpush3.bf16.msra.mxu0 %v3822_v0 }
 0xf76   :  { %3686 = vmatprep.subr.bf16.mxu0 %v3823_v12 }
 0xf79   :  { %3687 = vmatpush3.bf16.msra.mxu0 %v3823_v12 }
0x102b   :  { %v3674_v16 = vpop.f32.mrf.mxu1 }
0x102c   :  { %v4790_v39 = vadd.f32 %v3674_v16, %v3317_v60 }
0x102d   :  { %v2887_v61 = vpop.f32.mrf.mxu1 }
0x102e   :  { %v2920_v58 = vmul.f32 %v4790_v39, %v4790_v39  ;;  %v4794_v26 = vadd.f32 %v3317_v60, %v2887_v61 }
0x102f   :  { %v3675_v32 = vpop.f32.mrf.mxu1 }
0x1030   :  { %v2928_v11 = vmul.f32 %v2920_v58, %v4790_v39  ;;  %v2918_v51 = vmul.f32 %v4794_v26, %v4794_v26  ;;  %v4799_v56 = vadd.f32 %v3675_v32, %v3317_v60 }
0x1031   :  { %v2890_v28 = vpop.f32.mrf.mxu1 }
0x1032   :  { %v2936_v25 = vmul.f32 0.044715, %v2928_v11  ;;  %v2926_v47 = vmul.f32 %v2918_v51, %v4794_v26  ;;  %v2921_v3 = vmul.f32 %v4799_v56, %v4799_v56  ;;  %v4804_v18 = vadd.f32 %v3317_v60, %v2890_v28 }
0x1033   :  { %v3678_v22 = vpop.f32.mrf.mxu1 }
0x1034   :  { %v2944_v48 = vadd.f32 %v2936_v25, %v4790_v39  ;;  %v2934_v29 = vmul.f32 0.044715, %v2926_v47  ;;  %v2929_v14 = vmul.f32 %v2921_v3, %v4799_v56  ;;  %v2919_v63 = vmul.f32 %v4804_v18, %v4804_v18 }
0x1035   :  { %v4810_v52 = vadd.f32 %v3678_v22, %v3317_v60  ;;  %v2903_v40 = vpop.f32.mrf.mxu1 }
0x1036   :  { %v2952_v50 = vmul.f32 0.7978846, %v2944_v48  ;;  %v2942_v31 = vadd.f32 %v2934_v29, %v4794_v26  ;;  %v2937_v38 = vmul.f32 0.044715, %v2929_v14  ;;  %v2927_v17 = vmul.f32 %v2919_v63, %v4804_v18 }
0x1037   :  { %v2924_v1 = vmul.f32 %v4810_v52, %v4810_v52  ;;  %v4816_v6 = vadd.f32 %v3317_v60, %v2903_v40  ;;  %v3679_v57 = vpop.f32.mrf.mxu1 }
0x1038   :  { %v2950_v34 = vmul.f32 0.7978846, %v2942_v31  ;;  %v2945_v49 = vadd.f32 %v2937_v38, %v4799_v56  ;;  %v2935_v5 = vmul.f32 0.044715, %v2927_v17  ;;  %3984 = vtanh.f32 %v2952_v50 }
0x1039   :  { %v2932_v7 = vmul.f32 %v2924_v1, %v4810_v52  ;;  %v2922_v2 = vmul.f32 %v4816_v6, %v4816_v6  ;;  %v4822_v36 = vadd.f32 %v3679_v57, %v3317_v60  ;;  %v2906_v9 = vpop.f32.mrf.mxu1 }
0x103a   :  { %3986 = vtanh.f32 %v2950_v34  ;;  %v2953_v23 = vmul.f32 0.7978846, %v2945_v49  ;;  %v2943_v35 = vadd.f32 %v2935_v5, %v4804_v18  ;;  %v2907_v19 = vadd.f32 %v3317_v60, %v2906_v9 }
0x103b   :  { %v2940_v42 = vmul.f32 0.044715, %v2932_v7  ;;  %v2930_v41 = vmul.f32 %v2922_v2, %v4816_v6  ;;  %v2925_v30 = vmul.f32 %v4822_v36, %v4822_v36 }
0x103c   :  { %3988 = vtanh.f32 %v2953_v23  ;;  %v2951_v10 = vmul.f32 0.7978846, %v2943_v35  ;;  %v2923_v37 = vmul.f32 %v2907_v19, %v2907_v19 }
0x103d   :  { %v2948_v33 = vadd.f32 %v2940_v42, %v4810_v52  ;;  %v2938_v59 = vmul.f32 0.044715, %v2930_v41  ;;  %v2933_v44 = vmul.f32 %v2925_v30, %v4822_v36 }
0x103e   :  { %3990 = vtanh.f32 %v2951_v10  ;;  %v2931_v46 = vmul.f32 %v2923_v37, %v2907_v19  ;;  %v3004_v37 = vsub.s32 6, %v4115_v43 }
0x103f   :  { %v2956_v55 = vmul.f32 0.7978846, %v2948_v33  ;;  %v2946_v21 = vadd.f32 %v2938_v59, %v4816_v6  ;;  %v2941_v8 = vmul.f32 0.044715, %v2933_v44 }
0x1040   :  { %v2939_v53 = vmul.f32 0.044715, %v2931_v46  ;;  %v3005_v33 = vrot.slane %v4670_v15, %v3004_v37 }
0x1041   :  { %3992 = vtanh.f32 %v2956_v55  ;;  %v2954_v0 = vmul.f32 0.7978846, %v2946_v21  ;;  %v2949_v12 = vadd.f32 %v2941_v8, %v4822_v36 }
0x1042   :  { %v2947_v60 = vadd.f32 %v2939_v53, %v2907_v19 }
0x1043   :  { %3994 = vtanh.f32 %v2954_v0  ;;  %v2957_v16 = vmul.f32 0.7978846, %v2949_v12 }
0x1044   :  { %v2955_v61 = vmul.f32 0.7978846, %v2947_v60 }
0x1045   :  { %3996 = vtanh.f32 %v2957_v16  ;;  %v3985_v58 = vpop.eup %3984 }
0x1046   :  { %3998 = vtanh.f32 %v2955_v61  ;;  %v2968_v28 = vadd.f32 1.0, %v3985_v58 }
0x1047   :  { %v3987_v32 = vpop.eup %3986 }
0x1048   :  { %v2966_v11 = vadd.f32 1.0, %v3987_v32  ;;  %v2976_v29 = vmul.f32 0.5, %v2968_v28 }
0x1049   :  { %v3989_v51 = vpop.eup %3988 }
0x104a   :  { %v2969_v25 = vadd.f32 1.0, %v3989_v51  ;;  %v2974_v3 = vmul.f32 0.5, %v2966_v11  ;;  %v2984_v17 = vmul.f32 %v2976_v29, %v4790_v39 }
0x104b   :  { %v3991_v47 = vpop.eup %3990 }
0x104c   :  { %v2977_v22 = vmul.f32 0.5, %v2969_v25  ;;  %v2967_v48 = vadd.f32 1.0, %v3991_v47  ;;  %v2982_v31 = vmul.f32 %v2974_v3, %v4794_v26 }
0x104e   :  { %v3993_v14 = vpop.eup %3992  ;;  %v2975_v63 = vmul.f32 0.5, %v2967_v48  ;;  %v2985_v40 = vmul.f32 %v2977_v22, %v4799_v56 }
0x104f   :  { %v2972_v1 = vadd.f32 1.0, %v3993_v14 }
0x1050   :  { %v3995_v50 = vpop.eup %3994  ;;  %v2983_v38 = vmul.f32 %v2975_v63, %v4804_v18  ;;  %v2999_v7 = vpack.c.bf16 %v2985_v40, %v2984_v17 }
0x1051   :  { %v2970_v57 = vadd.f32 1.0, %v3995_v50  ;;  %v2980_v56 = vmul.f32 0.5, %v2972_v1 }
0x1052   :  { %v3997_v34 = vpop.eup %3996  ;;  %v2998_v49 = vpack.c.bf16 %v2983_v38, %v2982_v31 }
0x1053   :  { %v3999_v5 = vpop.eup %3998  ;;  %v2973_v2 = vadd.f32 1.0, %v3997_v34  ;;  %v2978_v9 = vmul.f32 0.5, %v2970_v57  ;;  %v2988_v41 = vmul.f32 %v2980_v56, %v4810_v52 }
0x1054   :  { %v2971_v23 = vadd.f32 1.0, %v3999_v5  ;;  %3688 = vmatprep.mubr.msk.bf16.mxu0 %vm3030_vm5, %v2998_v49 }
0x1055   :  { %v2981_v35 = vmul.f32 0.5, %v2973_v2  ;;  %3689 = vmatmul.mubr.msk.bf16.vlgmr.msra.gmra.mxu0 %vm3030_vm5, %v2999_v7  ;;  %v2986_v39 = vmul.f32 %v2978_v9, %v4816_v6 }
0x1056   :  { %v2979_v26 = vmul.f32 0.5, %v2971_v23 }
0x1057   :  { %v2989_v18 = vmul.f32 %v2981_v35, %v4822_v36 }
0x1058   :  { %v2987_v42 = vmul.f32 %v2979_v26, %v2907_v19 }
0x1059   :  { %v3001_v10 = vpack.c.bf16 %v2989_v18, %v2988_v41 }
0x105a   :  { %v3000_v30 = vpack.c.bf16 %v2987_v42, %v2986_v39 }
0x105c   :  { %3692 = vmatprep.mubr.msk.bf16.mxu0 %vm3030_vm5, %v3000_v30 }
0x105d   :  { %3693 = vmatmul.mubr.msk.bf16.gmra.mxu0 %vm3030_vm5, %v3001_v10 }
0x1115   :  { %v3690_v59 = vpop.f32.mrf.mxu0 }
0x1116   :  { %v3086_v44 = vadd.f32 %v3690_v59, %v3005_v33 }
0x1117   :  { %v3077_v46 = vpop.f32.mrf.mxu0 }
0x1118   :  { %v3110_v36 = vadd.f32 %v3086_v44, %v4750_v54  ;;  %v3078_v55 = vadd.f32 %v3077_v46, %v3005_v33 }
0x1119   :  { %v3691_v6 = vpop.f32.mrf.mxu0 }
0x111a   :  { %v3108_v19 = vadd.f32 %v3078_v55, %v4742_v13  ;;  %v3089_v52 = vadd.f32 %v3691_v6, %v3005_v33  ;;  %3152 = vxpose.xlu1.b32.start [1/2] (short) (narrow) %v3110_v36, 32 }
0x111b   :  { %v3080_v21 = vpop.f32.mrf.mxu0 }
0x111c   :  { %v3111_v8 = vadd.f32 %v3089_v52, %v4753_v27  ;;  %v3081_v53 = vadd.f32 %v3080_v21, %v3005_v33  ;;  %3116 = vxpose.xlu0.b32.start [1/2] (short) (narrow) %v3108_v19, 32 }
0x111d   :  { %v3694_v0 = vpop.f32.mrf.mxu0 }
0x111e   :  { %v3109_v43 = vadd.f32 %v3081_v53, %v4744_v24  ;;  %3153 = vxpose.xlu1.b32.end [2/2] (short) (narrow) %v3111_v8, 32  ;;  %v3102_v12 = vadd.f32 %v3694_v0, %v3005_v33 }
0x111f   :  { %v3093_v15 = vpop.f32.mrf.mxu0 }
0x1120   :  { %3117 = vxpose.xlu0.b32.end [2/2] (short) (narrow) %v3109_v43, 32  ;;  %v3094_v54 = vadd.f32 %v3093_v15, %v3005_v33  ;;  %v3114_v61 = vadd.f32 %v3102_v12, %v4767_v45 }
0x1121   :  { %v3695_v60 = vpop.f32.mrf.mxu0 }
0x1122   :  { %v3105_v13 = vadd.f32 %v3695_v60, %v3005_v33  ;;  %v3112_v58 = vadd.f32 %v3094_v54, %v4758_v4 }
0x1123   :  { %v3096_v16 = vpop.f32.mrf.mxu0 }
0x1124   :  { %v3097_v32 = vadd.f32 %v3096_v16, %v3005_v33  ;;  %v3115_v27 = vadd.f32 %v3105_v13, %v4770_v62 }
0x1126   :  { %v3113_v11 = vadd.f32 %v3097_v32, %v4762_v20 }
0x1127   :  { %3226 = vxpose.xlu1.b32.start [1/2] (short) (narrow) %v3114_v61, 32 }
0x1129   :  { %3189 = vxpose.xlu0.b32.start [1/2] (short) (narrow) %v3112_v58, 32 }
0x112b   :  { %3227 = vxpose.xlu1.b32.end [2/2] (short) (narrow) %v3115_v27, 32 }
0x112d   :  { %3190 = vxpose.xlu0.b32.end [2/2] (short) (narrow) %v3113_v11, 32 }
0x1196   :  { %v3168_v24 = vpop.trf.xlu1 }
0x1197   :  { %3332 = vst.msk [vmem:[%s4924_s7 + $0x20] sm:$0xff] %vm722_vm3, %v3168_v24 }
0x1198   :  { %v3132_v51 = vpop.trf.xlu0 }
0x1199   :  { %3148 = vst.msk [vmem:[%s4924_s7] sm:$0xff] %vm722_vm3, %v3132_v51 }
0x119a   :  { %v3169_v4 = vpop.trf.xlu1 }
0x119b   :  { %3333 = vst.msk [vmem:[%s4924_s7 + $0x28] sm:$0xff] %vm722_vm3, %v3169_v4 }
0x119c   :  { %v3133_v20 = vpop.trf.xlu0 }
0x119d   :  { %3149 = vst.msk [vmem:[%s4924_s7 + $0x8] sm:$0xff] %vm722_vm3, %v3133_v20 }
0x119e   :  { %v3170_v45 = vpop.trf.xlu1 }
0x119f   :  { %3334 = vst.msk [vmem:[%s4924_s7 + $0x30] sm:$0xff] %vm722_vm3, %v3170_v45 }
0x11a0   :  { %v3134_v62 = vpop.trf.xlu0 }
0x11a1   :  { %3150 = vst.msk [vmem:[%s4924_s7 + $0x10] sm:$0xff] %vm722_vm3, %v3134_v62 }
0x11a2   :  { %v3171_v28 = vpop.trf.xlu1 }
0x11a3   :  { %3335 = vst.msk [vmem:[%s4924_s7 + $0x38] sm:$0xff] %vm722_vm3, %v3171_v28 }
0x11a4   :  { %v3135_v25 = vpop.trf.xlu0 }
0x11a5   :  { %3151 = vst.msk [vmem:[%s4924_s7 + $0x18] sm:$0xff] %vm722_vm3, %v3135_v25 }
0x11a6   :  { %v3242_v47 = vpop.trf.xlu1 }
0x11a7   :  { %3340 = vst.msk [vmem:[%s4924_s7 + $0x60] sm:$0xff] %vm722_vm3, %v3242_v47 }
0x11a8   :  { %v3205_v3 = vpop.trf.xlu0 }
0x11a9   :  { %3336 = vst.msk [vmem:[%s4924_s7 + $0x40] sm:$0xff] %vm722_vm3, %v3205_v3 }
0x11aa   :  { %v3243_v22 = vpop.trf.xlu1 }
0x11ab   :  { %3341 = vst.msk [vmem:[%s4924_s7 + $0x68] sm:$0xff] %vm722_vm3, %v3243_v22 }
0x11ac   :  { %v3206_v48 = vpop.trf.xlu0 }
0x11ad   :  { %3337 = vst.msk [vmem:[%s4924_s7 + $0x48] sm:$0xff] %vm722_vm3, %v3206_v48 }
0x11ae   :  { %v3244_v29 = vpop.trf.xlu1 }
0x11af   :  { %3342 = vst.msk [vmem:[%s4924_s7 + $0x70] sm:$0xff] %vm722_vm3, %v3244_v29 }
0x11b0   :  { %v3207_v14 = vpop.trf.xlu0 }
0x11b1   :  { %3338 = vst.msk [vmem:[%s4924_s7 + $0x50] sm:$0xff] %vm722_vm3, %v3207_v14 }
0x11b2   :  { %v3245_v63 = vpop.trf.xlu1 }
0x11b3   :  { %3343 = vst.msk [vmem:[%s4924_s7 + $0x78] sm:$0xff] %vm722_vm3, %v3245_v63 }
0x11b4   :  { %v3208_v40 = vpop.trf.xlu0 }
0x11b5   :  { %3339 = vst.msk [vmem:[%s4924_s7 + $0x58] sm:$0xff] %vm722_vm3, %v3208_v40 }

</bundles_post_ra>
